<compile_context>
chip_gen: v6e
topology: v6e:2x2x1
jax: 0.10.0
libtpu: 0.0.40
codegen_flags: <defaults>
</compile_context>

<pallas_src>
import jax
import jax.numpy as jnp
from jax.experimental import pallas as pl
from jax.experimental.pallas import tpu as pltpu

EPS = 1e-5
_VMEM_LIMIT = 32 * 1024 * 1024  # safe on v5e/v6e (128 MiB) and v7x (64 MiB)


# --------------------------------------------------------------------------
# Kernels
# --------------------------------------------------------------------------
def _conv3x3_stats_kernel(x_ref, w_ref, y_ref, s_ref):
    """3x3 conv (stride 1) on one haloed row tile + fused BN partial stats.

    x_ref : (TH+2, W+2, C)  input row tile, 1-row/1-col zero halo included
    w_ref : (9*C, C)        weights, row block k = tap (dh*3 + dw)
    y_ref : (TH, W, C)      pre-BN conv output tile
    s_ref : (2, C)          per-tile [sum, sum of squares] over TH*W pixels
    """
    thp2, wp, c = x_ref.shape
    th, w = thp2 - 2, wp - 2

    # im2col: read each tap window directly from the ref and concatenate along
    # the channel (lane) axis -> a single MXU matmul with contraction K = 9*C.
    pieces = []
    for dh in range(3):
        for dw in range(3):
            tap = x_ref[pl.ds(dh, th), pl.ds(dw, w), :]
            pieces.append(tap.reshape(th * w, c))
    patches = jnp.concatenate(pieces, axis=-1)                     # (TH*W, 9C)
    acc = jnp.dot(patches, w_ref[...], preferred_element_type=jnp.float32)

    y_ref[...] = acc.reshape(th, w, c).astype(y_ref.dtype)

    # BN statistics fused into the conv pass (variance = E[x^2] - mean^2 later).
    ssum = jnp.sum(acc, axis=0, keepdims=True)                     # (1, C)
    ssq = jnp.sum(acc * acc, axis=0, keepdims=True)                # (1, C)
    s_ref[...] = jnp.concatenate([ssum, ssq], axis=0)              # (2, C)


def _bn_residual_kernel(x_ref, y_ref, scale_ref, shift_ref, o_ref):
    """out = x + (y * scale + shift)  -- BN2 normalization + skip connection."""
    o_ref[...] = (x_ref[...].astype(jnp.float32)
                  + y_ref[...] * scale_ref[...]
                  + shift_ref[...]).astype(o_ref.dtype)


# --------------------------------------------------------------------------
# Tiled pallas_call wrappers
# --------------------------------------------------------------------------
def _row_tile(h, max_rows=8):
    th = min(max_rows, h)
    while h % th:
        th -= 1
    return th


def _conv3x3_with_stats(x_nhwc, w_flat, th):
    """Tiled 3x3 conv (pad=1, no bias) + per-channel sum/sumsq partials."""
    n, h, w, c = x_nhwc.shape
    gh = h // th
    wp = w + 2

    xpad = jnp.pad(x_nhwc, ((0, 0), (1, 1), (1, 1), (0, 0)))
    # Overlapping row windows (1-row halo each side): (N, GH, TH+2, W+2, C).
    # One fused XLA repack supplies the conv halo so the Pallas grid blocks are
    # non-overlapping and fully auto-pipelined.
    x_tiles = jnp.stack([xpad[:, i * th:i * th + th + 2] for i in range(gh)],
                        axis=1)

    y, stats = pl.pallas_call(
        _conv3x3_stats_kernel,
        out_shape=(
            jax.ShapeDtypeStruct((n, h, w, c), jnp.float32),
            jax.ShapeDtypeStruct((n, gh, 2, c), jnp.float32),
        ),
        grid=(n, gh),
        in_specs=[
            pl.BlockSpec((None, None, th + 2, wp, c),
                         lambda i, j: (i, j, 0, 0, 0)),
            pl.BlockSpec((9 * c, c), lambda i, j: (0, 0)),
        ],
        out_specs=(
            pl.BlockSpec((None, th, w, c), lambda i, j: (i, j, 0, 0)),
            pl.BlockSpec((None, None, 2, c), lambda i, j: (i, j, 0, 0)),
        ),
        compiler_params=pltpu.CompilerParams(
            dimension_semantics=("parallel", "parallel"),
            vmem_limit_bytes=_VMEM_LIMIT),
    )(x_tiles, w_flat)
    return y, stats


def _bn_affine_from_stats(stats, gamma, beta, count):
    """Fold training-mode BN into a per-channel (scale, shift)."""
    s = jnp.sum(stats.astype(jnp.float32), axis=(0, 1))            # (2, C)
    mean = s[0] / count
    var = s[1] / count - mean * mean                               # biased var
    scale = gamma * jax.lax.rsqrt(var + EPS)
    shift = beta - mean * scale
    return scale, shift


def _bn_residual(x_nhwc, y_nhwc, scale, shift, th):
    n, h, w, c = x_nhwc.shape
    gh = h // th
    return pl.pallas_call(
        _bn_residual_kernel,
        out_shape=jax.ShapeDtypeStruct((n, h, w, c), x_nhwc.dtype),
        grid=(n, gh),
        in_specs=[
            pl.BlockSpec((None, th, w, c), lambda i, j: (i, j, 0, 0)),
            pl.BlockSpec((None, th, w, c), lambda i, j: (i, j, 0, 0)),
            pl.BlockSpec((1, 1, c), lambda i, j: (0, 0, 0)),
            pl.BlockSpec((1, 1, c), lambda i, j: (0, 0, 0)),
        ],
        out_specs=pl.BlockSpec((None, th, w, c), lambda i, j: (i, j, 0, 0)),
        compiler_params=pltpu.CompilerParams(
            dimension_semantics=("parallel", "parallel"),
            vmem_limit_bytes=_VMEM_LIMIT),
    )(x_nhwc, y_nhwc, scale.reshape(1, 1, c), shift.reshape(1, 1, c))


# --------------------------------------------------------------------------
# Public forward (NCHW in / NCHW out, PyTorch parity)
# --------------------------------------------------------------------------
def resnet_block(x_nchw, w1, g1, b1, w2, g2, b2, *, row_tile=8):
    """x_nchw: (N, C, H, W); w*: torch layout (Cout, Cin, 3, 3); g*/b*: (C,)."""
    n, c, h, w = x_nchw.shape
    th = _row_tile(h, row_tile)
    count = n * h * w

    x = jnp.transpose(x_nchw, (0, 2, 3, 1)).astype(jnp.float32)    # NCHW->NHWC
    # (Cout, Cin, kh, kw) -> (kh, kw, Cin, Cout) -> (9*Cin, Cout)
    w1k = jnp.transpose(w1, (2, 3, 1, 0)).reshape(9 * c, c).astype(jnp.float32)
    w2k = jnp.transpose(w2, (2, 3, 1, 0)).reshape(9 * c, c).astype(jnp.float32)

    # Phase 1: conv1 + BN1 batch statistics (fused, one pass over the data).
    y1, s1 = _conv3x3_with_stats(x, w1k, th)
    scale1, shift1 = _bn_affine_from_stats(s1, g1, b1, count)
    # BN1 normalize + ReLU: pointwise; fuses into phase 2's pad/halo repack.
    h1 = jnp.maximum(y1 * scale1.reshape(1, 1, 1, c)
                     + shift1.reshape(1, 1, 1, c), 0.0)

    # Phase 2: conv2 + BN2 batch statistics.
    y2, s2 = _conv3x3_with_stats(h1, w2k, th)
    scale2, shift2 = _bn_affine_from_stats(s2, g2, b2, count)

    # Phase 3: BN2 normalize + residual add (tiled pointwise kernel).
    out = _bn_residual(x, y2, scale2, shift2, th)
    return jnp.transpose(out, (0, 3, 1, 2)).astype(x_nchw.dtype)   # NHWC->NCHW


# --------------------------------------------------------------------------
# Pure-JAX reference (mirrors the PyTorch forward with training-mode BN)
# --------------------------------------------------------------------------
def _reference(x_nchw, w1, g1, b1, w2, g2, b2):
    def conv(hh, ww):
        return jax.lax.conv_general_dilated(
            hh, ww, window_strides=(1, 1), padding=((1, 1), (1, 1)),
            dimension_numbers=('NCHW', 'OIHW', 'NCHW'))

    def bn(hh, g, b):
        m = jnp.mean(hh, axis=(0, 2, 3), keepdims=True)
        v = jnp.mean((hh - m) ** 2, axis=(0, 2, 3), keepdims=True)
        return ((hh - m) * jax.lax.rsqrt(v + EPS) * g.reshape(1, -1, 1, 1)
                + b.reshape(1, -1, 1, 1))

    hh = jax.nn.relu(bn(conv(x_nchw, w1), g1, b1))
    hh = bn(conv(hh, w2), g2, b2)
    return x_nchw + hh


if __name__ == "__main__":
    # dim=64 is the module's default; batch=2, spatial=16 keep it small.
    N, C, H, W = 2, 64, 16, 16
    key = jax.random.PRNGKey(0)
    kx, kw1, kw2 = jax.random.split(key, 3)

    x = jax.random.normal(kx, (N, C, H, W), dtype=jnp.float32)
    # Conv2d weights (synthetic deterministic init), torch layout (Cout,Cin,3,3)
    w1 = 0.1 * jax.random.normal(kw1, (C, C, 3, 3), dtype=jnp.float32)
    w2 = 0.1 * jax.random.normal(kw2, (C, C, 3, 3), dtype=jnp.float32)
    # BatchNorm2d default affine init: weight=1, bias=0
    g1 = jnp.ones((C,), jnp.float32); b1 = jnp.zeros((C,), jnp.float32)
    g2 = jnp.ones((C,), jnp.float32); b2 = jnp.zeros((C,), jnp.float32)

    fwd = jax.jit(resnet_block)
    out = jax.block_until_ready(fwd(x, w1, g1, b1, w2, g2, b2))

    ref = _reference(x, w1, g1, b1, w2, g2, b2)
    assert out.shape == (N, C, H, W)
    err = float(jnp.max(jnp.abs(out - ref)))
    assert err < 2e-3, f"mismatch vs pure-JAX reference: max abs err = {err}"

    print("KERNEL_OK")
</pallas_src>

<mosaic_0001>
module attributes {stable_mosaic.version = 11 : i64} {
  func.func @_conv3x3_stats_kernel(%arg0: i32, %arg1: i32, %arg2: memref<1x1x10x18x64xf32, #tpu.memory_space<vmem>>, %arg3: memref<576x64xf32, #tpu.memory_space<vmem>>, %arg4: memref<1x8x16x64xf32, #tpu.memory_space<vmem>>, %arg5: memref<1x1x2x64xf32, #tpu.memory_space<vmem>>) attributes {dimension_semantics = [#tpu.dimension_semantics<parallel>, #tpu.dimension_semantics<parallel>], iteration_bounds = array<i64: 2, 2>, scalar_prefetch = 0 : i64, scratch_operands = 0 : i64, tpu.core_type = #tpu.core_type<tc>, window_params = [{transform_indices = @transform_0, window_bounds = array<i64: 1, 1, 10, 18, 64>}, {pipeline_mode = #tpu.pipeline_mode<synchronous>, transform_indices = @transform_1, window_bounds = array<i64: 576, 64>}, {transform_indices = @transform_2, window_bounds = array<i64: 1, 8, 16, 64>}, {transform_indices = @transform_3, window_bounds = array<i64: 1, 1, 2, 64>}]} {
    %c0 = arith.constant 0 : index
    %c0_0 = arith.constant 0 : index
    %c0_1 = arith.constant 0 : index
    %c0_2 = arith.constant 0 : index
    %c0_3 = arith.constant 0 : index
    %0 = vector.load %arg2[%c0, %c0_0, %c0_1, %c0_2, %c0_3] : memref<1x1x10x18x64xf32, #tpu.memory_space<vmem>>, vector<1x1x8x16x64xf32>
    %1 = vector.shape_cast %0 : vector<1x1x8x16x64xf32> to vector<8x16x64xf32>
    %2 = vector.shape_cast %1 : vector<8x16x64xf32> to vector<128x64xf32>
    %c0_4 = arith.constant 0 : index
    %c0_5 = arith.constant 0 : index
    %c0_6 = arith.constant 0 : index
    %c1 = arith.constant 1 : index
    %c0_7 = arith.constant 0 : index
    %3 = vector.load %arg2[%c0_4, %c0_5, %c0_6, %c1, %c0_7] : memref<1x1x10x18x64xf32, #tpu.memory_space<vmem>>, vector<1x1x8x16x64xf32>
    %4 = vector.shape_cast %3 : vector<1x1x8x16x64xf32> to vector<8x16x64xf32>
    %5 = vector.shape_cast %4 : vector<8x16x64xf32> to vector<128x64xf32>
    %c0_8 = arith.constant 0 : index
    %c0_9 = arith.constant 0 : index
    %c0_10 = arith.constant 0 : index
    %c2 = arith.constant 2 : index
    %c0_11 = arith.constant 0 : index
    %6 = vector.load %arg2[%c0_8, %c0_9, %c0_10, %c2, %c0_11] : memref<1x1x10x18x64xf32, #tpu.memory_space<vmem>>, vector<1x1x8x16x64xf32>
    %7 = vector.shape_cast %6 : vector<1x1x8x16x64xf32> to vector<8x16x64xf32>
    %8 = vector.shape_cast %7 : vector<8x16x64xf32> to vector<128x64xf32>
    %c0_12 = arith.constant 0 : index
    %c0_13 = arith.constant 0 : index
    %c1_14 = arith.constant 1 : index
    %c0_15 = arith.constant 0 : index
    %c0_16 = arith.constant 0 : index
    %9 = vector.load %arg2[%c0_12, %c0_13, %c1_14, %c0_15, %c0_16] : memref<1x1x10x18x64xf32, #tpu.memory_space<vmem>>, vector<1x1x8x16x64xf32>
    %10 = vector.shape_cast %9 : vector<1x1x8x16x64xf32> to vector<8x16x64xf32>
    %11 = vector.shape_cast %10 : vector<8x16x64xf32> to vector<128x64xf32>
    %c0_17 = arith.constant 0 : index
    %c0_18 = arith.constant 0 : index
    %c1_19 = arith.constant 1 : index
    %c1_20 = arith.constant 1 : index
    %c0_21 = arith.constant 0 : index
    %12 = vector.load %arg2[%c0_17, %c0_18, %c1_19, %c1_20, %c0_21] : memref<1x1x10x18x64xf32, #tpu.memory_space<vmem>>, vector<1x1x8x16x64xf32>
    %13 = vector.shape_cast %12 : vector<1x1x8x16x64xf32> to vector<8x16x64xf32>
    %14 = vector.shape_cast %13 : vector<8x16x64xf32> to vector<128x64xf32>
    %c0_22 = arith.constant 0 : index
    %c0_23 = arith.constant 0 : index
    %c1_24 = arith.constant 1 : index
    %c2_25 = arith.constant 2 : index
    %c0_26 = arith.constant 0 : index
    %15 = vector.load %arg2[%c0_22, %c0_23, %c1_24, %c2_25, %c0_26] : memref<1x1x10x18x64xf32, #tpu.memory_space<vmem>>, vector<1x1x8x16x64xf32>
    %16 = vector.shape_cast %15 : vector<1x1x8x16x64xf32> to vector<8x16x64xf32>
    %17 = vector.shape_cast %16 : vector<8x16x64xf32> to vector<128x64xf32>
    %c0_27 = arith.constant 0 : index
    %c0_28 = arith.constant 0 : index
    %c2_29 = arith.constant 2 : index
    %c0_30 = arith.constant 0 : index
    %c0_31 = arith.constant 0 : index
    %18 = vector.load %arg2[%c0_27, %c0_28, %c2_29, %c0_30, %c0_31] : memref<1x1x10x18x64xf32, #tpu.memory_space<vmem>>, vector<1x1x8x16x64xf32>
    %19 = vector.shape_cast %18 : vector<1x1x8x16x64xf32> to vector<8x16x64xf32>
    %20 = vector.shape_cast %19 : vector<8x16x64xf32> to vector<128x64xf32>
    %c0_32 = arith.constant 0 : index
    %c0_33 = arith.constant 0 : index
    %c2_34 = arith.constant 2 : index
    %c1_35 = arith.constant 1 : index
    %c0_36 = arith.constant 0 : index
    %21 = vector.load %arg2[%c0_32, %c0_33, %c2_34, %c1_35, %c0_36] : memref<1x1x10x18x64xf32, #tpu.memory_space<vmem>>, vector<1x1x8x16x64xf32>
    %22 = vector.shape_cast %21 : vector<1x1x8x16x64xf32> to vector<8x16x64xf32>
    %23 = vector.shape_cast %22 : vector<8x16x64xf32> to vector<128x64xf32>
    %c0_37 = arith.constant 0 : index
    %c0_38 = arith.constant 0 : index
    %c2_39 = arith.constant 2 : index
    %c2_40 = arith.constant 2 : index
    %c0_41 = arith.constant 0 : index
    %24 = vector.load %arg2[%c0_37, %c0_38, %c2_39, %c2_40, %c0_41] : memref<1x1x10x18x64xf32, #tpu.memory_space<vmem>>, vector<1x1x8x16x64xf32>
    %25 = vector.shape_cast %24 : vector<1x1x8x16x64xf32> to vector<8x16x64xf32>
    %26 = vector.shape_cast %25 : vector<8x16x64xf32> to vector<128x64xf32>
    %27 = tpu.concatenate %2, %5, %8, %11, %14, %17, %20, %23, %26 in 1 : vector<128x64xf32>, vector<128x64xf32>, vector<128x64xf32>, vector<128x64xf32>, vector<128x64xf32>, vector<128x64xf32>, vector<128x64xf32>, vector<128x64xf32>, vector<128x64xf32> -> vector<128x576xf32>
    %c0_42 = arith.constant 0 : index
    %c0_43 = arith.constant 0 : index
    %28 = vector.load %arg3[%c0_42, %c0_43] : memref<576x64xf32, #tpu.memory_space<vmem>>, vector<576x64xf32>
    %cst = arith.constant dense<0.000000e+00> : vector<128x64xf32>
    %29 = tpu.matmul %27, %28, %cst {dimension_numbers = #tpu.dot_dimension_numbers<[1], [0], [0], [1], [0, 0, 1, 1], [], []>} : vector<128x576xf32>, vector<576x64xf32>, vector<128x64xf32> -> vector<128x64xf32>
    %30 = vector.shape_cast %29 : vector<128x64xf32> to vector<8x16x64xf32>
    %c0_44 = arith.constant 0 : index
    %c0_45 = arith.constant 0 : index
    %c0_46 = arith.constant 0 : index
    %c0_47 = arith.constant 0 : index
    %31 = vector.load %arg4[%c0_44, %c0_45, %c0_46, %c0_47] : memref<1x8x16x64xf32, #tpu.memory_space<vmem>>, vector<1x8x16x64xf32>
    %32 = vector.shape_cast %31 : vector<1x8x16x64xf32> to vector<8x16x64xf32>
    %33 = vector.shape_cast %30 : vector<8x16x64xf32> to vector<1x8x16x64xf32>
    tpu.vector_store %arg4[%c0_44, %c0_45, %c0_46, %c0_47], %33 {strides = array<i32>} : memref<1x8x16x64xf32, #tpu.memory_space<vmem>>, vector<1x8x16x64xf32>,
    %cst_48 = arith.constant dense<0.000000e+00> : vector<64xf32>
    %34 = vector.multi_reduction <add>, %29, %cst_48 [0] : vector<128x64xf32> to vector<64xf32>
    %35 = vector.shape_cast %34 : vector<64xf32> to vector<1x64xf32>
    %36 = arith.mulf %29, %29 : vector<128x64xf32>
    %cst_49 = arith.constant dense<0.000000e+00> : vector<64xf32>
    %37 = vector.multi_reduction <add>, %36, %cst_49 [0] : vector<128x64xf32> to vector<64xf32>
    %38 = vector.shape_cast %37 : vector<64xf32> to vector<1x64xf32>
    %39 = tpu.concatenate %35, %38 in 0 : vector<1x64xf32>, vector<1x64xf32> -> vector<2x64xf32>
    %c0_50 = arith.constant 0 : index
    %c0_51 = arith.constant 0 : index
    %c0_52 = arith.constant 0 : index
    %c0_53 = arith.constant 0 : index
    %40 = vector.load %arg5[%c0_50, %c0_51, %c0_52, %c0_53] : memref<1x1x2x64xf32, #tpu.memory_space<vmem>>, vector<1x1x2x64xf32>
    %41 = vector.shape_cast %40 : vector<1x1x2x64xf32> to vector<2x64xf32>
    %42 = vector.shape_cast %39 : vector<2x64xf32> to vector<1x1x2x64xf32>
    tpu.vector_store %arg5[%c0_50, %c0_51, %c0_52, %c0_53], %42 {strides = array<i32>} : memref<1x1x2x64xf32, #tpu.memory_space<vmem>>, vector<1x1x2x64xf32>,
    return
  }
  func.func @transform_0(%arg0: i32, %arg1: i32) -> (i32, i32, i32, i32, i32) {
    %c0_i32 = arith.constant 0 : i32
    %c0_i32_0 = arith.constant 0 : i32
    %c0_i32_1 = arith.constant 0 : i32
    %c0_i32_2 = arith.constant 0 : i32
    return %arg0, %arg1, %c0_i32, %c0_i32_0, %c0_i32_1 : i32, i32, i32, i32, i32
  }
  func.func @transform_1(%arg0: i32, %arg1: i32) -> (i32, i32) {
    %c0_i32 = arith.constant 0 : i32
    %c0_i32_0 = arith.constant 0 : i32
    %c0_i32_1 = arith.constant 0 : i32
    return %c0_i32, %c0_i32_0 : i32, i32
  }
  func.func @transform_2(%arg0: i32, %arg1: i32) -> (i32, i32, i32, i32) {
    %c0_i32 = arith.constant 0 : i32
    %c0_i32_0 = arith.constant 0 : i32
    %c0_i32_1 = arith.constant 0 : i32
    return %arg0, %arg1, %c0_i32, %c0_i32_0 : i32, i32, i32, i32
  }
  func.func @transform_3(%arg0: i32, %arg1: i32) -> (i32, i32, i32, i32) {
    %c0_i32 = arith.constant 0 : i32
    %c0_i32_0 = arith.constant 0 : i32
    %c0_i32_1 = arith.constant 0 : i32
    return %arg0, %arg1, %c0_i32, %c0_i32_0 : i32, i32, i32, i32
  }
}

module attributes {stable_mosaic.version = 11 : i64} {
  func.func @_bn_residual_kernel(%arg0: i32, %arg1: i32, %arg2: memref<1x8x16x64xf32, #tpu.memory_space<vmem>>, %arg3: memref<1x8x16x64xf32, #tpu.memory_space<vmem>>, %arg4: memref<1x1x64xf32, #tpu.memory_space<vmem>>, %arg5: memref<1x1x64xf32, #tpu.memory_space<vmem>>, %arg6: memref<1x8x16x64xf32, #tpu.memory_space<vmem>>) attributes {dimension_semantics = [#tpu.dimension_semantics<parallel>, #tpu.dimension_semantics<parallel>], iteration_bounds = array<i64: 2, 2>, scalar_prefetch = 0 : i64, scratch_operands = 0 : i64, tpu.core_type = #tpu.core_type<tc>, window_params = [{transform_indices = @transform_0, window_bounds = array<i64: 1, 8, 16, 64>}, {transform_indices = @transform_1, window_bounds = array<i64: 1, 8, 16, 64>}, {pipeline_mode = #tpu.pipeline_mode<synchronous>, transform_indices = @transform_2, window_bounds = array<i64: 1, 1, 64>}, {pipeline_mode = #tpu.pipeline_mode<synchronous>, transform_indices = @transform_3, window_bounds = array<i64: 1, 1, 64>}, {transform_indices = @transform_4, window_bounds = array<i64: 1, 8, 16, 64>}]} {
    %c0 = arith.constant 0 : index
    %c0_0 = arith.constant 0 : index
    %c0_1 = arith.constant 0 : index
    %c0_2 = arith.constant 0 : index
    %0 = vector.load %arg2[%c0, %c0_0, %c0_1, %c0_2] : memref<1x8x16x64xf32, #tpu.memory_space<vmem>>, vector<1x8x16x64xf32>
    %1 = vector.shape_cast %0 : vector<1x8x16x64xf32> to vector<8x16x64xf32>
    %c0_3 = arith.constant 0 : index
    %c0_4 = arith.constant 0 : index
    %c0_5 = arith.constant 0 : index
    %c0_6 = arith.constant 0 : index
    %2 = vector.load %arg3[%c0_3, %c0_4, %c0_5, %c0_6] : memref<1x8x16x64xf32, #tpu.memory_space<vmem>>, vector<1x8x16x64xf32>
    %3 = vector.shape_cast %2 : vector<1x8x16x64xf32> to vector<8x16x64xf32>
    %c0_7 = arith.constant 0 : index
    %c0_8 = arith.constant 0 : index
    %c0_9 = arith.constant 0 : index
    %4 = vector.load %arg4[%c0_7, %c0_8, %c0_9] : memref<1x1x64xf32, #tpu.memory_space<vmem>>, vector<1x1x64xf32>
    %5 = vector.broadcast %4 : vector<1x1x64xf32> to vector<8x16x64xf32>
    %6 = arith.mulf %3, %5 : vector<8x16x64xf32>
    %7 = arith.addf %1, %6 : vector<8x16x64xf32>
    %c0_10 = arith.constant 0 : index
    %c0_11 = arith.constant 0 : index
    %c0_12 = arith.constant 0 : index
    %8 = vector.load %arg5[%c0_10, %c0_11, %c0_12] : memref<1x1x64xf32, #tpu.memory_space<vmem>>, vector<1x1x64xf32>
    %9 = vector.broadcast %8 : vector<1x1x64xf32> to vector<8x16x64xf32>
    %10 = arith.addf %7, %9 : vector<8x16x64xf32>
    %c0_13 = arith.constant 0 : index
    %c0_14 = arith.constant 0 : index
    %c0_15 = arith.constant 0 : index
    %c0_16 = arith.constant 0 : index
    %11 = vector.load %arg6[%c0_13, %c0_14, %c0_15, %c0_16] : memref<1x8x16x64xf32, #tpu.memory_space<vmem>>, vector<1x8x16x64xf32>
    %12 = vector.shape_cast %11 : vector<1x8x16x64xf32> to vector<8x16x64xf32>
    %13 = vector.shape_cast %10 : vector<8x16x64xf32> to vector<1x8x16x64xf32>
    tpu.vector_store %arg6[%c0_13, %c0_14, %c0_15, %c0_16], %13 {strides = array<i32>} : memref<1x8x16x64xf32, #tpu.memory_space<vmem>>, vector<1x8x16x64xf32>,
    return
  }
  func.func @transform_0(%arg0: i32, %arg1: i32) -> (i32, i32, i32, i32) {
    %c0_i32 = arith.constant 0 : i32
    %c0_i32_0 = arith.constant 0 : i32
    %c0_i32_1 = arith.constant 0 : i32
    return %arg0, %arg1, %c0_i32, %c0_i32_0 : i32, i32, i32, i32
  }
  func.func @transform_1(%arg0: i32, %arg1: i32) -> (i32, i32, i32, i32) {
    %c0_i32 = arith.constant 0 : i32
    %c0_i32_0 = arith.constant 0 : i32
    %c0_i32_1 = arith.constant 0 : i32
    return %arg0, %arg1, %c0_i32, %c0_i32_0 : i32, i32, i32, i32
  }
  func.func @transform_2(%arg0: i32, %arg1: i32) -> (i32, i32, i32) {
    %c0_i32 = arith.constant 0 : i32
    %c0_i32_0 = arith.constant 0 : i32
    %c0_i32_1 = arith.constant 0 : i32
    %c0_i32_2 = arith.constant 0 : i32
    return %c0_i32, %c0_i32_0, %c0_i32_1 : i32, i32, i32
  }
  func.func @transform_3(%arg0: i32, %arg1: i32) -> (i32, i32, i32) {
    %c0_i32 = arith.constant 0 : i32
    %c0_i32_0 = arith.constant 0 : i32
    %c0_i32_1 = arith.constant 0 : i32
    %c0_i32_2 = arith.constant 0 : i32
    return %c0_i32, %c0_i32_0, %c0_i32_1 : i32, i32, i32
  }
  func.func @transform_4(%arg0: i32, %arg1: i32) -> (i32, i32, i32, i32) {
    %c0_i32 = arith.constant 0 : i32
    %c0_i32_0 = arith.constant 0 : i32
    %c0_i32_1 = arith.constant 0 : i32
    return %arg0, %arg1, %c0_i32, %c0_i32_0 : i32, i32, i32, i32
  }
}

</mosaic_0001>

<bundles_post_ra>
// kernel: resnet_block.5
= control target key start
LH: loop header
LB: loop body
LE: loop exit
PB: predicated region body
PF: predicated region fallthrough
CT: control target
= control target key end

     0   :  { %9 = vsyncpa [#allocation3], 0  ;;  %s983_s0 = inlined_call_operand.vmem [shape: f32[2,16,16,64], index: 0, kind: input, shape index: {}]   ;;  %s984_s1 = inlined_call_operand.vmem [shape: f32[2,16,16,64], index: 1, kind: input, shape index: {}]   ;;  %s985_s2 = inlined_call_operand.vmem [shape: f32[1,1,64], index: 2, kind: input, shape index: {}]   ;;  %s986_s3 = inlined_call_operand.vmem [shape: f32[1,1,64], index: 3, kind: input, shape index: {}]   ;;  %s987_s4 = inlined_call_operand.hbm [shape: f32[2,16,16,64], index: 4, kind: output, shape index: {}]  }
   0x1   :  { %11 = vsyncpa [#allocation3 + $0x1], 0  ;;  %s722_s15 = smov 0   ;;  %s724_s16 = smov 0  }
   0x2   :  { %s726_s17 = smov 0   ;;  %s728_s18 = smov 0  }
   0x3   :  { %s730_s19 = smov 0   ;;  %s732_s20 = smov 0  }
   0x4   :  { %s734_s21 = smov 0   ;;  %s736_s22 = smov 0  }
   0x5 LB: > { %s503_s23 = sadd.s32 4294967295, %s692_s22   ;;  %s504_s24 = sadd.s32 4294967294, %s692_s22   ;;  %s692_s22 = sphi %s736_s22, %s17_s22   ;;  %s688_s21 = sphi %s734_s21, %s999_s21   ;;  %s684_s20 = sphi %s732_s20, %s998_s20   ;;  %s680_s19 = sphi %s730_s19, %s997_s19   ;;  %s676_s18 = sphi %s728_s18, %s996_s18   ;;  %s672_s17 = sphi %s726_s17, %s995_s17   ;;  %s668_s16 = sphi %s724_s16, %s994_s16   ;;  %s664_s15 = sphi %s722_s15, %s993_s15  }
   0x6   : > { %s26_s25 = sadd.s32 1, %s684_s20  ;;  %s29_s26 = sadd.s32 1, %s688_s21 }
   0x7   : > { %p27_p0 = scmp.ge.s32.totalorder %s26_s25, 2  ;;  %p146_p1 = scmp.ne.s32.totalorder %s672_s17, %s668_s16 }
   0x8   : > { %p147_p2 = scmp.eq.s32.totalorder %s503_s23, 3  ;;  %p152_p5 = scmp.ne.s32.totalorder %s668_s16, %s664_s15 }
   0x9   : > { %s1001_s25 = smov (%p27_p0, %s26_s25), 0  ;;  %s1003_s26 = smov (!%p27_p0, %s29_s26), %s688_s21 }
   0xa   : > { %s132_s27 = ssub.s32 %s684_s20, %s1001_s25  ;;  %p773_p3 = por %p147_p2, %p146_p1 }
   0xb   : > { %p31_p4 = scmp.ge.s32.totalorder %s1003_s26, 2  ;;  %p153_p6 = scmp.eq.s32.totalorder %s504_s24, 3 }
   0xc   : > { %p507_p7 = scmp.ge.s32.totalorder %s692_s22, 1  ;;  %p205_p9 = scmp.lt.s32.totalorder %s692_s22, 5 }
   0xd   : > { %s1005_s26 = smov (%p31_p4, %s1003_s26), 0  ;;  %p782_p8 = por %p153_p6, %p152_p5 }
   0xe   : > { %990 = sst [smem:[#allocation5_spill]] %s1005_s26  ;;  %s131_s30 = ssub.s32 %s688_s21, %s1005_s26 }
   0xf   : > { %s136_s5 = sadd.s32 1, %s672_s17  ;;  %s133_s6 = sor.u32 %s132_s27, %s131_s30 }
  0x10   : > { %p206_p10 = pnand %p507_p7, %p205_p9  ;;  %p134_p11 = scmp.eq.s32.totalorder %s133_s6, 0 }
  0x11   : > { %s509_s8 = sshll.u32 (!%p206_p10), %s676_s18, 3  ;;  %p247_p12 = scmp.lt.s32.totalorder (!%p206_p10), %s680_s19, 1 }
  0x12   : > { %s791_s7 = scalar_select %p134_p11, %s672_s17, %s136_s5  }
  0x13   : > { %209 = sbr.rel (%p206_p10) target bundleno = 64 (0x40), region = 36  ;;  %p249_p13 = scmp.lt.s32.totalorder (!%p206_p10), %s509_s8, 15 }
  0x14   : > { %s243_s13 = sand.u32 (!%p206_p10), 1, %s668_s16  }
  0x15   : > { %s822_s26 = sshll.u32 (!%p206_p10), %s243_s13, 7 }
  0x18   : > { %s248_s9 = scalar_select %p247_p12, %s680_s19, 1  ;;  %v800_v0 = vld [vmem:[%s985_s2] ss:$0 sm:$0xff]  ;;  %vm363_vm0 = vcmask 523264  }
  0x19   : > { %s1007_s8 = smov (!%p249_p13, %s509_s8), 15  ;;  %v817_v3 = vld [vmem:[%s986_s3] ss:$0 sm:$0xff] }
  0x1a   : > { %s511_s10 = sshll.u32 %s248_s9, 5  ;;  %s510_s11 = sshll.u32 %s1007_s8, 1 }
  0x1b   : > { %s253_s12 = sadd.s32 %s511_s10, %s510_s11  ;;  %s852_s11 = scalar_lea.vmem [#allocation2], %s822_s26 }
  0x1c   : > { %s512_s14 = sshll.u32 %s253_s12, 3  ;;  %s526_s12 = sshll.u32 %s676_s18, 4 }
  0x1d   : > { %s805_s5 = scalar_lea.vmem %s983_s0, %s512_s14  ;;  %s810_s8 = scalar_lea.vmem %s984_s1, %s512_s14 }
  0x1e   : > { %v269_v1 = vld [vmem:[%s805_s5] sm:$0xff]  ;;  %v270_v4 = vld [vmem:[%s805_s5 + $0x8] sm:$0xff]  ;;  %v271_v7 = vld [vmem:[%s805_s5 + $0x10] sm:$0xff]  ;;  %s522_s14 = sshll.u32 %s680_s19, 5  ;;  %s397_s23 = sshll.u32 %s852_s11, 4  ;;  %s923_s23 = int_to_ptr.vmem [resolvable:$true] %s397_s23 }
  0x1f   : > { %v285_v2 = vld [vmem:[%s810_s8] sm:$0xff]  ;;  %v286_v6 = vld [vmem:[%s810_s8 + $0x8] sm:$0xff]  ;;  %v287_v8 = vld [vmem:[%s810_s8 + $0x10] sm:$0xff]  ;;  %s394_s18 = sadd.s32 %s526_s12, %s522_s14  ;;  %s600_s6 = scalar_lea.vmem %s923_s23, 2048 }
  0x20   : > { %v308_v5 = vmul.f32 %v800_v0, %v285_v2  ;;  %v309_v9 = vmul.f32 %v800_v0, %v286_v6  ;;  %v310_v10 = vmul.f32 %v800_v0, %v287_v8  ;;  %v272_v11 = vld [vmem:[%s805_s5 + $0x18] sm:$0xff]  ;;  %v273_v13 = vld [vmem:[%s805_s5 + $0x20] sm:$0xff]  ;;  %v274_v17 = vld [vmem:[%s805_s5 + $0x28] sm:$0xff]  ;;  %s523_s19 = sshll.u32 %s394_s18, 7  ;;  %p601_p0 = scmp.ne.s32.totalorder %s923_s23, %s600_s6 }
  0x21   : > { %v288_v12 = vld [vmem:[%s810_s8 + $0x18] sm:$0xff]  ;;  %v289_v16 = vld [vmem:[%s810_s8 + $0x20] sm:$0xff]  ;;  %v290_v18 = vld [vmem:[%s810_s8 + $0x28] sm:$0xff]  ;;  %s921_s30 = scalar_lea.hbm %s987_s4, %s523_s19 }
  0x22   : > { %v324_v14 = vadd.f32 %v308_v5, %v269_v1  ;;  %v311_v15 = vmul.f32 %v800_v0, %v288_v12  ;;  %v325_v19 = vadd.f32 %v309_v9, %v270_v4  ;;  %v326_v20 = vadd.f32 %v310_v10, %v271_v7  ;;  %v275_v23 = vld [vmem:[%s805_s5 + $0x30] sm:$0xff]  ;;  %v276_v28 = vld [vmem:[%s805_s5 + $0x38] sm:$0xff]  ;;  %v293_v30 = vld [vmem:[%s810_s8 + $0x40] sm:$0xff]  ;;  %p602_p1 = pnand %p601_p0, %p773_p3 }
  0x23   : > { %v312_v21 = vmul.f32 %v800_v0, %v289_v16  ;;  %v313_v22 = vmul.f32 %v800_v0, %v290_v18  ;;  %v291_v24 = vld [vmem:[%s810_s8 + $0x30] sm:$0xff]  ;;  %v292_v29 = vld [vmem:[%s810_s8 + $0x38] sm:$0xff]  ;;  %v277_v35 = vld [vmem:[%s805_s5 + $0x40] sm:$0xff]  ;;  %v316_v41 = vmul.f32 %v800_v0, %v293_v30 }
  0x24   : > { %v347_v25 = vadd.f32 %v817_v3, %v324_v14  ;;  %v327_v26 = vadd.f32 %v311_v15, %v272_v11  ;;  %v314_v27 = vmul.f32 %v800_v0, %v291_v24  ;;  %v348_v31 = vadd.f32 %v817_v3, %v325_v19  ;;  %v278_v36 = vld [vmem:[%s805_s5 + $0x48] sm:$0xff]  ;;  %v279_v42 = vld [vmem:[%s805_s5 + $0x50] sm:$0xff]  ;;  %v296_v44 = vld [vmem:[%s810_s8 + $0x58] sm:$0xff]  ;;  %p603_p2 = pneg %p602_p1 }
  0x25   : > { %v349_v32 = vadd.f32 %v817_v3, %v326_v20  ;;  %v328_v33 = vadd.f32 %v312_v21, %v273_v13  ;;  %v329_v34 = vadd.f32 %v313_v22, %v274_v17  ;;  %v294_v37 = vld [vmem:[%s810_s8 + $0x48] sm:$0xff]  ;;  %v315_v40 = vmul.f32 %v800_v0, %v292_v29  ;;  %v295_v43 = vld [vmem:[%s810_s8 + $0x50] sm:$0xff]  ;;  %v280_v49 = vld [vmem:[%s805_s5 + $0x58] sm:$0xff] }
  0x26   : > { %364 = vst.msk [vmem:[%s852_s11] sm:$0xff] %vm363_vm0, %v347_v25  ;;  %v350_v38 = vadd.f32 %v817_v3, %v327_v26  ;;  %v330_v39 = vadd.f32 %v314_v27, %v275_v23  ;;  %365 = vst.msk [vmem:[%s852_s11 + $0x8] sm:$0xff] %vm363_vm0, %v348_v31  ;;  %v317_v47 = vmul.f32 %v800_v0, %v294_v37  ;;  %v281_v50 = vld [vmem:[%s805_s5 + $0x60] sm:$0xff]  ;;  %v282_v56 = vld [vmem:[%s805_s5 + $0x68] sm:$0xff] }
  0x27   : > { %366 = vst.msk [vmem:[%s852_s11 + $0x10] sm:$0xff] %vm363_vm0, %v349_v32  ;;  %v351_v45 = vadd.f32 %v817_v3, %v328_v33  ;;  %v352_v46 = vadd.f32 %v817_v3, %v329_v34  ;;  %v318_v48 = vmul.f32 %v800_v0, %v295_v43  ;;  %v297_v51 = vld [vmem:[%s810_s8 + $0x60] sm:$0xff]  ;;  %v331_v53 = vadd.f32 %v315_v40, %v276_v28  ;;  %v298_v57 = vld [vmem:[%s810_s8 + $0x68] sm:$0xff]  ;;  %v299_v58 = vld [vmem:[%s810_s8 + $0x70] sm:$0xff] }
  0x28   : > { %367 = vst.msk [vmem:[%s852_s11 + $0x18] sm:$0xff] %vm363_vm0, %v350_v38  ;;  %v353_v52 = vadd.f32 %v817_v3, %v330_v39  ;;  %v332_v54 = vadd.f32 %v316_v41, %v277_v35  ;;  %v319_v55 = vmul.f32 %v800_v0, %v296_v44  ;;  %v333_v59 = vadd.f32 %v317_v47, %v278_v36  ;;  %v283_v63 = vld [vmem:[%s805_s5 + $0x70] sm:$0xff]  ;;  %v300_v1 = vld [vmem:[%s810_s8 + $0x78] sm:$0xff]  ;;  %s694_s8 = smov [#allocation2]  }
  0x29   : > { %368 = vst.msk [vmem:[%s852_s11 + $0x20] sm:$0xff] %vm363_vm0, %v351_v45  ;;  %369 = vst.msk [vmem:[%s852_s11 + $0x28] sm:$0xff] %vm363_vm0, %v352_v46  ;;  %v334_v60 = vadd.f32 %v318_v48, %v279_v42  ;;  %v320_v61 = vmul.f32 %v800_v0, %v297_v51  ;;  %v321_v62 = vmul.f32 %v800_v0, %v298_v57  ;;  %v284_v11 = vld [vmem:[%s805_s5 + $0x78] sm:$0xff]  ;;  %s932_s5 = scalar_lea.sflag [#allocation3], %s243_s13  ;;  %s604_s9 = sshll.u32 %s694_s8, 4  ;;  %s605_s9 = int_to_ptr.vmem [resolvable:$false] %s604_s9 }
  0x2a   : > { %370 = vst.msk [vmem:[%s852_s11 + $0x30] sm:$0xff] %vm363_vm0, %v353_v52  ;;  %v354_v2 = vadd.f32 %v817_v3, %v331_v53  ;;  %v355_v4 = vadd.f32 %v817_v3, %v332_v54  ;;  %v335_v5 = vadd.f32 %v319_v55, %v280_v49  ;;  %v322_v6 = vmul.f32 %v800_v0, %v299_v58  ;;  %s606_s10 = scalar_lea.vmem %s605_s9, 4096  ;;  %p607_p4 = scmp.lt.s32.totalorder %s923_s23, %s605_s9 }
  0x2b   : > { %v356_v7 = vadd.f32 %v817_v3, %v333_v59  ;;  %v357_v8 = vadd.f32 %v817_v3, %v334_v60  ;;  %v336_v9 = vadd.f32 %v320_v61, %v281_v50  ;;  %v337_v10 = vadd.f32 %v321_v62, %v282_v56  ;;  %p608_p5 = scmp.lt.s32.totalorder %s606_s10, %s600_s6 }
  0x2c   : > { %371 = vst.msk [vmem:[%s852_s11 + $0x38] sm:$0xff] %vm363_vm0, %v354_v2  ;;  %372 = vst.msk [vmem:[%s852_s11 + $0x40] sm:$0xff] %vm363_vm0, %v355_v4  ;;  %v358_v12 = vadd.f32 %v817_v3, %v335_v5  ;;  %v338_v13 = vadd.f32 %v322_v6, %v283_v63  ;;  %v323_v14 = vmul.f32 %v800_v0, %v300_v1 }
  0x2d   : > { %373 = vst.msk [vmem:[%s852_s11 + $0x48] sm:$0xff] %vm363_vm0, %v356_v7  ;;  %374 = vst.msk [vmem:[%s852_s11 + $0x50] sm:$0xff] %vm363_vm0, %v357_v8  ;;  %v359_v15 = vadd.f32 %v817_v3, %v336_v9  ;;  %v360_v16 = vadd.f32 %v817_v3, %v337_v10  ;;  %p609_p6 = por %p608_p5, %p607_p4 }
  0x2e   : > { %375 = vst.msk [vmem:[%s852_s11 + $0x58] sm:$0xff] %vm363_vm0, %v358_v12  ;;  %v361_v17 = vadd.f32 %v817_v3, %v338_v13  ;;  %v339_v18 = vadd.f32 %v323_v14, %v284_v11 }
  0x2f   : > { %376 = vst.msk [vmem:[%s852_s11 + $0x60] sm:$0xff] %vm363_vm0, %v359_v15  ;;  %377 = vst.msk [vmem:[%s852_s11 + $0x68] sm:$0xff] %vm363_vm0, %v360_v16  ;;  %p610_p7 = pnand %p609_p6, %p603_p2 }
  0x30   : > { %378 = vst.msk [vmem:[%s852_s11 + $0x70] sm:$0xff] %vm363_vm0, %v361_v17  ;;  %v362_v0 = vadd.f32 %v817_v3, %v339_v18 }
  0x32   : > { %379 = vst.msk [vmem:[%s852_s11 + $0x78] sm:$0xff] %vm363_vm0, %v362_v0 }
  0x33   : > { %613 = shalt.err (!%p610_p7)
}
  0x34   : > { %s614_s13 = scalar_lea.hbm %s921_s30, 2048  ;;  %s618_s12 = scalar_lea.hbm %s987_s4, 8192 }
  0x35   : > { %p615_p9 = scmp.ne.s32.totalorder %s921_s30, %s614_s13  ;;  %p619_p12 = scmp.lt.s32.totalorder %s921_s30, %s987_s4 }
  0x36   : > { %p620_p13 = scmp.lt.s32.totalorder %s618_s12, %s614_s13 }
  0x37   : > { %p616_p10 = pnand %p615_p9, %p773_p3 }
  0x38   : > { %p621_p0 = por %p620_p13, %p619_p12 }
  0x39   : > { %p617_p11 = pneg %p616_p10 }
  0x3b   : > { %p622_p1 = pnand %p621_p0, %p617_p11 }
  0x3d   : > { %625 = shalt.err (!%p622_p1)
}
  0x3e   : > { %s695_s19 = smov 128   ;;  %s696_s24 = smov 8  }
  0x3f   : > { %527 = dma.vmem_to_hbm [thread:$0]  (%p773_p3), %s923_s23, 2048, %s921_s30, %s932_s5, %s695_s19, %s695_s19, %s696_s24  }
  0x40 PF: > { %p533_p2 = scmp.ge.s32.totalorder %s692_s22, 2  ;;  %s412_s27 = sand.u32 1, %s664_s15  }
  0x41   : > { %s413_s6 = scalar_lea.sflag [#allocation3], %s412_s27 }
  0x42   : > { %p530_p4 = pnand %p533_p2, %p782_p8 }
  0x44   : > { %p531_p5 = pneg %p530_p4 }
  0x46   : > { %659 = dma.done.wait (%p531_p5), %s413_s6, 2048  }
  0x47   : > { %661 = vsyncadd (%p531_p5), %s413_s6, 4294965248  ;;  %s17_s22 = sadd.s32 1, %s692_s22   ;;  %s992_s28 = sld [smem:[#allocation5_spill]] }
  0x48   : > { %p14_p6 = scmp.ge.s32.totalorder %s17_s22, 6   ;;  %s993_s15 = smov %s668_s16 }
  0x49   : > { %s994_s16 = smov %s672_s17  ;;  %s995_s17 = smov %s791_s7 }
  0x4a   : > { %s996_s18 = smov %s684_s20  ;;  %s997_s19 = smov %s688_s21 }
  0x4b   : > { %s998_s20 = smov %s1001_s25  ;;  %16 = sbr.rel (!%p14_p6) target bundleno = 5 (0x5), region = 74 }
  0x4d   : > { %s999_s21 = smov %s992_s28 }
  0x50   :  { %418 = vsyncpa [#allocation3], 1 }
  0x51   :  { %420 = vsyncpa [#allocation3 + $0x1], 1 }

// kernel: resnet_block.3
= control target key start
LH: loop header
LB: loop body
LE: loop exit
PB: predicated region body
PF: predicated region fallthrough
CT: control target
= control target key end

     0   :  { %s2139_s12 = smov 0   ;;  %s2141_s13 = smov 0   ;;  %s3032_s0 = inlined_call_operand.vmem [shape: f32[2,2,10,18,64], index: 0, kind: input, shape index: {}]   ;;  %s3033_s1 = inlined_call_operand.vmem [shape: f32[576,64], index: 1, kind: input, shape index: {}]   ;;  %s3034_s2 = inlined_call_operand.vmem [shape: f32[2,16,16,64], index: 2, kind: output, shape index: {0}]   ;;  %s3035_s3 = inlined_call_operand.vmem [shape: f32[2,2,2,64], index: 3, kind: output, shape index: {1}]  }
   0x1   :  { %s2143_s14 = smov 0   ;;  %s2145_s15 = smov 0  }
   0x2   :  { %s2147_s16 = smov 0  }
   0x3 LB: > { %s23_s17 = sadd.s32 1, %s2108_s14  ;;  %s26_s18 = sadd.s32 1, %s2112_s15  ;;  %s2116_s16 = sphi %s2147_s16, %s14_s16   ;;  %s2112_s15 = sphi %s2145_s15, %s3054_s15   ;;  %s2108_s14 = sphi %s2143_s14, %s3053_s14   ;;  %s2104_s13 = sphi %s2141_s13, %s3052_s13   ;;  %s2100_s12 = sphi %s2139_s12, %s3051_s12  }
   0x4   : > { %p24_p0 = scmp.ge.s32.totalorder %s23_s17, 2  ;;  %p1513_p1 = scmp.ge.s32.totalorder %s2116_s16, 1 }
   0x5   : > { %p162_p2 = scmp.lt.s32.totalorder %s2116_s16, 5 }
   0x6   : > { %s3056_s17 = smov (%p24_p0, %s23_s17), 0  ;;  %s3058_s18 = smov (!%p24_p0, %s26_s18), %s2112_s15 }
   0x7   : > { %p163_p3 = pnand %p1513_p1, %p162_p2  ;;  %p28_p4 = scmp.ge.s32.totalorder %s3058_s18, 2 }
   0x9   : > { %s3060_s18 = smov (%p28_p4, %s3058_s18), 0  ;;  %166 = sbr.rel (%p163_p3) target bundleno = 456 (0x1c8), region = 28 }
   0xe   : > { %p203_p5 = scmp.lt.s32.totalorder %s2104_s13, 1  ;;  %p205_p6 = scmp.lt.s32.totalorder %s2100_s12, 1  ;;  %v729_v0 = vld [vmem:[%s3033_s1 + $0xf8] sm:$0xff]  ;;  %v728_v2 = vld [vmem:[%s3033_s1 + $0xf0] sm:$0xff]  ;;  %v727_v4 = vld [vmem:[%s3033_s1 + $0xe8] sm:$0xff]  ;;  %vm633_vm0 = vcmask 523264  }
   0xf   : > { %v713_v1 = vld [vmem:[%s3033_s1 + $0x78] sm:$0xff]  ;;  %1635 = vmatprep.subr.mxu0 %v729_v0  ;;  %v712_v3 = vld [vmem:[%s3033_s1 + $0x70] sm:$0xff]  ;;  %v711_v5 = vld [vmem:[%s3033_s1 + $0x68] sm:$0xff]  ;;  %s2118_s20 = smov 64   ;;  %vm1359_vm1 = vcmask 1040384   ;;  %vm1361_vm2 = vcmask 517120  }
  0x10   : > { %s3062_s13 = smov (!%p203_p5, %s2104_s13), 1  ;;  %1636 = vmatpush3.msra.mxu0 %v713_v1  ;;  %v761_v6 = vld [vmem:[%s3033_s1 + $0x1f8] sm:$0xff]  ;;  %v726_v7 = vld [vmem:[%s3033_s1 + $0xe0] sm:$0xff]  ;;  %v760_v9 = vld [vmem:[%s3033_s1 + $0x1f0] sm:$0xff] }
  0x11   : > { %s2190_s29 = scalar_select %p205_p6, %s2100_s12, 1  ;;  %1637 = vmatprep.subr.mxu0 %v728_v2  ;;  %1715 = vmatprep.subr.mxu1 %v761_v6  ;;  %v745_v8 = vld [vmem:[%s3033_s1 + $0x178] sm:$0xff]  ;;  %v710_v10 = vld [vmem:[%s3033_s1 + $0x60] sm:$0xff]  ;;  %v744_v11 = vld [vmem:[%s3033_s1 + $0x170] sm:$0xff] }
  0x12   : > { %s1876_s7 = smul.u32 60, %s3062_s13  ;;  %1638 = vmatpush3.msra.mxu0 %v712_v3  ;;  %1716 = vmatpush3.msra.mxu1 %v745_v8  ;;  %v725_v12 = vld [vmem:[%s3033_s1 + $0xd8] sm:$0xff]  ;;  %v759_v13 = vld [vmem:[%s3033_s1 + $0x1e8] sm:$0xff]  ;;  %v758_v16 = vld [vmem:[%s3033_s1 + $0x1e0] sm:$0xff]  ;;  %s1517_s4 = sshll.u32 %s3062_s13, 5 }
  0x13   : > { %s1875_s21 = smul.u32 30, %s2190_s29  ;;  %1639 = vmatprep.subr.mxu0 %v727_v4  ;;  %1717 = vmatprep.subr.mxu1 %v760_v9  ;;  %v743_v14 = vld [vmem:[%s3033_s1 + $0x168] sm:$0xff]  ;;  %v709_v15 = vld [vmem:[%s3033_s1 + $0x58] sm:$0xff]  ;;  %v724_v17 = vld [vmem:[%s3033_s1 + $0xd0] sm:$0xff] }
  0x14   : > { %1640 = vmatpush3.msra.mxu0 %v711_v5  ;;  %1718 = vmatpush3.msra.mxu1 %v744_v11  ;;  %v708_v18 = vld [vmem:[%s3033_s1 + $0x50] sm:$0xff]  ;;  %v742_v19 = vld [vmem:[%s3033_s1 + $0x160] sm:$0xff]  ;;  %v723_v20 = vld [vmem:[%s3033_s1 + $0xc8] sm:$0xff] }
  0x15   : > { %s209_s6 = sadd.s32 %s1876_s7, %s1875_s21  ;;  %1641 = vmatprep.subr.mxu0 %v726_v7  ;;  %1719 = vmatprep.subr.mxu1 %v759_v13  ;;  %v707_v21 = vld [vmem:[%s3033_s1 + $0x48] sm:$0xff]  ;;  %v757_v22 = vld [vmem:[%s3033_s1 + $0x1d8] sm:$0xff]  ;;  %v722_v26 = vld [vmem:[%s3033_s1 + $0xc0] sm:$0xff] }
  0x16   : > { %s1514_s19 = sshll.u32 %s209_s6, 3  ;;  %1642 = vmatpush3.msra.mxu0 %v710_v10  ;;  %1720 = vmatpush3.msra.mxu1 %v743_v14  ;;  %v741_v34 = vld [vmem:[%s3033_s1 + $0x158] sm:$0xff]  ;;  %v706_v36 = vld [vmem:[%s3033_s1 + $0x40] sm:$0xff]  ;;  %v720_v43 = vld [vmem:[%s3033_s1 + $0xb0] sm:$0xff] }
  0x17   : > { %s2242_s27 = scalar_lea.vmem %s3032_s0, %s1514_s19  ;;  %1643 = vmatprep.subr.mxu0 %v725_v12  ;;  %1721 = vmatprep.subr.mxu1 %v758_v16  ;;  %v721_v40 = vld [vmem:[%s3033_s1 + $0xb8] sm:$0xff]  ;;  %v704_v45 = vld [vmem:[%s3033_s1 + $0x30] sm:$0xff]  ;;  %v719_v61 = vld [vmem:[%s3033_s1 + $0xa8] sm:$0xff] }
  0x18   : > { %v247_v23 = vld [vmem:[%s2242_s27 + $0x1] sm:$0xff]  ;;  %v2255_v24 = vld [vmem:[%s2242_s27 + $0x18] sm:$0xff]  ;;  %1644 = vmatpush3.msra.mxu0 %v709_v15  ;;  %v2265_v28 = vld [vmem:[%s2242_s27 + $0x30] sm:$0xff]  ;;  %1722 = vmatpush3.msra.mxu1 %v742_v19 }
  0x19   : > { %v2258_v25 = vld [vmem:[%s2242_s27 + $0x19] sm:$0xff]  ;;  %v1918_v27 = vpack.i.bf16 %v247_v23, %v2255_v24  ;;  %v248_v29 = vld [vmem:[%s2242_s27 + $0x9] sm:$0xff]  ;;  %1645 = vmatprep.subr.mxu0 %v724_v17  ;;  %v2274_v32 = vld [vmem:[%s2242_s27 + $0x21] sm:$0xff]  ;;  %1723 = vmatprep.subr.mxu1 %v757_v22 }
  0x1a   : > { %v2269_v30 = vld [vmem:[%s2242_s27 + $0x20] sm:$0xff]  ;;  %v1928_v31 = vpack.i.bf16 %v2258_v25, %v2265_v28  ;;  %v2277_v33 = vld [vmem:[%s2242_s27 + $0x38] sm:$0xff]  ;;  %1646 = vmatpush3.msra.mxu0 %v708_v18  ;;  %v2291_v38 = vld [vmem:[%s2242_s27 + $0x48] sm:$0xff]  ;;  %1724 = vmatpush3.msra.mxu1 %v741_v34 }
  0x1b   : > { %1919 = vrot.lane.b32.xlu0 %v1918_v27, %s2118_s20  ;;  %v1923_v35 = vpack.i.bf16 %v248_v29, %v2269_v30  ;;  %1647 = vmatprep.subr.mxu0 %v723_v20  ;;  %v1933_v37 = vpack.i.bf16 %v2274_v32, %v2277_v33  ;;  %v2294_v39 = vld [vmem:[%s2242_s27 + $0x31] sm:$0xff]  ;;  %v2300_v41 = vld [vmem:[%s2242_s27 + $0x1a] sm:$0xff]  ;;  %v2324_v49 = vld [vmem:[%s2242_s27 + $0x22] sm:$0xff] }
  0x1c   : > { %1929 = vrot.lane.b32.xlu1 %v1928_v31, %s2118_s20  ;;  %1648 = vmatpush3.msra.mxu0 %v707_v21  ;;  %v705_v42 = vld [vmem:[%s3033_s1 + $0x38] sm:$0xff]  ;;  %v1938_v44 = vpack.i.bf16 %v2294_v39, %v2291_v38  ;;  %v1943_v46 = vpack.i.bf16 %v2300_v41, %v2294_v39  ;;  %v2318_v47 = vld [vmem:[%s2242_s27 + $0x50] sm:$0xff]  ;;  %v2333_v52 = vld [vmem:[%s2242_s27 + $0x60] sm:$0xff] }
  0x1d   : > { %1649 = vmatprep.subr.mxu0 %v722_v26  ;;  %v2321_v48 = vld [vmem:[%s2242_s27 + $0x39] sm:$0xff]  ;;  %v2336_v53 = vld [vmem:[%s2242_s27 + $0x49] sm:$0xff]  ;;  %v2351_v58 = vld [vmem:[%s2242_s27 + $0x51] sm:$0xff] }
  0x1e   : > { %1650 = vmatpush3.msra.mxu0 %v706_v36  ;;  %v1948_v50 = vpack.i.bf16 %v2321_v48, %v2318_v47  ;;  %v1953_v51 = vpack.i.bf16 %v2324_v49, %v2321_v48  ;;  %v2339_v54 = vld [vmem:[%s2242_s27 + $0x32] sm:$0xff]  ;;  %v1958_v55 = vpack.i.bf16 %v2336_v53, %v2333_v52  ;;  %v2348_v57 = vld [vmem:[%s2242_s27 + $0x68] sm:$0xff]  ;;  %v2354_v59 = vld [vmem:[%s2242_s27 + $0x3a] sm:$0xff] }
  0x1f   : > { %1924 = vrot.lane.b32.xlu0 %v1923_v35, %s2118_s20  ;;  %1651 = vmatprep.subr.mxu0 %v721_v40  ;;  %v1963_v56 = vpack.i.bf16 %v2339_v54, %v2336_v53  ;;  %v756_v60 = vld [vmem:[%s3033_s1 + $0x1d0] sm:$0xff]  ;;  %v703_v63 = vld [vmem:[%s3033_s1 + $0x28] sm:$0xff]  ;;  %v1968_v1 = vpack.i.bf16 %v2351_v58, %v2348_v57  ;;  %v718_v2 = vld [vmem:[%s3033_s1 + $0xa0] sm:$0xff]  ;;  %v1973_v5 = vpack.i.bf16 %v2354_v59, %v2351_v58 }
  0x20   : > { %1934 = vrot.lane.b32.xlu1 %v1933_v37, %s2118_s20  ;;  %1652 = vmatpush3.msra.mxu0 %v705_v42  ;;  %v740_v62 = vld [vmem:[%s3033_s1 + $0x150] sm:$0xff]  ;;  %v755_v0 = vld [vmem:[%s3033_s1 + $0x1c8] sm:$0xff]  ;;  %v702_v4 = vld [vmem:[%s3033_s1 + $0x20] sm:$0xff] }
  0x21   : > { %1653 = vmatprep.subr.mxu0 %v720_v43  ;;  %1725 = vmatprep.subr.mxu1 %v756_v60  ;;  %v739_v3 = vld [vmem:[%s3033_s1 + $0x148] sm:$0xff]  ;;  %v2387_v6 = vld [vmem:[%s2242_s27 + $0x78] sm:$0xff]  ;;  %v754_v8 = vld [vmem:[%s3033_s1 + $0x1c0] sm:$0xff] }
  0x22   : > { %1654 = vmatpush3.msra.mxu0 %v704_v45  ;;  %1726 = vmatpush3.msra.mxu1 %v740_v62  ;;  %v2390_v7 = vld [vmem:[%s2242_s27 + $0x61] sm:$0xff]  ;;  %v2396_v9 = vld [vmem:[%s2242_s27 + $0x4a] sm:$0xff]  ;;  %v717_v10 = vld [vmem:[%s3033_s1 + $0x98] sm:$0xff] }
  0x23   : > { %1939 = vrot.lane.b32.xlu0 %v1938_v44, %s2118_s20  ;;  %1655 = vmatprep.subr.mxu0 %v719_v61  ;;  %v738_v11 = vld [vmem:[%s3033_s1 + $0x140] sm:$0xff]  ;;  %v701_v12 = vld [vmem:[%s3033_s1 + $0x18] sm:$0xff]  ;;  %v1978_v13 = vpack.i.bf16 %v2390_v7, %v2387_v6  ;;  %v716_v15 = vld [vmem:[%s3033_s1 + $0x90] sm:$0xff]  ;;  %v1983_v16 = vpack.i.bf16 %v2396_v9, %v2390_v7 }
  0x24   : > { %1944 = vrot.lane.b32.xlu1 %v1943_v46, %s2118_s20  ;;  %1656 = vmatpush3.msra.mxu0 %v703_v63  ;;  %v753_v14 = vld [vmem:[%s3033_s1 + $0x1b8] sm:$0xff]  ;;  %v2420_v17 = vld [vmem:[%s2242_s27 + $0x80] sm:$0xff]  ;;  %v2423_v18 = vld [vmem:[%s2242_s27 + $0x69] sm:$0xff] }
  0x25   : > { %1727 = vmatprep.subr.mxu1 %v755_v0  ;;  %1657 = vmatprep.subr.mxu0 %v718_v2  ;;  %v737_v19 = vld [vmem:[%s3033_s1 + $0x138] sm:$0xff]  ;;  %v700_v21 = vld [vmem:[%s3033_s1 + $0x10] sm:$0xff]  ;;  %v715_v23 = vld [vmem:[%s3033_s1 + $0x88] sm:$0xff]  ;;  %v1988_v26 = vpack.i.bf16 %v2423_v18, %v2420_v17 }
  0x26   : > { %1728 = vmatpush3.msra.mxu1 %v739_v3  ;;  %1658 = vmatpush3.msra.mxu0 %v702_v4  ;;  %v2429_v20 = vld [vmem:[%s2242_s27 + $0x52] sm:$0xff]  ;;  %v699_v29 = vld [vmem:[%s3033_s1 + $0x8] sm:$0xff]  ;;  %v714_v40 = vld [vmem:[%s3033_s1 + $0x80] sm:$0xff] }
  0x27   : > { %1949 = vrot.lane.b32.xlu0 %v1948_v50, %s2118_s20  ;;  %1729 = vmatprep.subr.mxu1 %v754_v8  ;;  %v752_v22 = vld [vmem:[%s3033_s1 + $0x1b0] sm:$0xff]  ;;  %v1993_v31 = vpack.i.bf16 %v2429_v20, %v2423_v18  ;;  %v2456_v35 = vld [vmem:[%s2242_s27 + $0x79] sm:$0xff]  ;;  %v751_v36 = vld [vmem:[%s3033_s1 + $0x1a8] sm:$0xff] }
  0x28   : > { %1954 = vrot.lane.b32.xlu1 %v1953_v51, %s2118_s20  ;;  %1659 = vmatprep.subr.mxu0 %v717_v10  ;;  %v736_v27 = vld [vmem:[%s3033_s1 + $0x130] sm:$0xff]  ;;  %v2462_v37 = vld [vmem:[%s2242_s27 + $0x62] sm:$0xff]  ;;  %v2482_v46 = vld [vmem:[%s3033_s1 + $0x238] sm:$0xff] }
  0x29   : > { %1730 = vmatpush3.msra.mxu1 %v738_v11  ;;  %1660 = vmatpush3.msra.mxu0 %v701_v12  ;;  %v2453_v34 = vld [vmem:[%s2242_s27 + $0x90] sm:$0xff]  ;;  %v735_v42 = vld [vmem:[%s3033_s1 + $0x128] sm:$0xff]  ;;  %v698_v43 = vld [vmem:[%s3033_s1] sm:$0xff]  ;;  %v2003_v50 = vpack.i.bf16 %v2462_v37, %v2456_v35 }
  0x2a   : > { %1731 = vmatprep.subr.mxu1 %v753_v14  ;;  %1661 = vmatprep.subr.mxu0 %v716_v15  ;;  %v1998_v44 = vpack.i.bf16 %v2456_v35, %v2453_v34  ;;  %v750_v45 = vld [vmem:[%s3033_s1 + $0x1a0] sm:$0xff]  ;;  %v2488_v51 = vld [vmem:[%s2242_s27 + $0x98] sm:$0xff]  ;;  %v2497_v60 = vld [vmem:[%s2242_s27 + $0x6a] sm:$0xff] }
  0x2b   : > { %1959 = vrot.lane.b32.xlu0 %v1958_v55, %s2118_s20  ;;  %1732 = vmatpush3.msra.mxu1 %v737_v19  ;;  %v2491_v55 = vld [vmem:[%s2242_s27 + $0x81] sm:$0xff]  ;;  %v749_v61 = vld [vmem:[%s3033_s1 + $0x198] sm:$0xff]  ;;  %v748_v0 = vld [vmem:[%s3033_s1 + $0x190] sm:$0xff] }
  0x2c   : > { %1964 = vrot.lane.b32.xlu1 %v1963_v56, %s2118_s20  ;;  %1662 = vmatpush3.msra.mxu0 %v700_v21  ;;  %v734_v56 = vld [vmem:[%s3033_s1 + $0x120] sm:$0xff]  ;;  %v733_v62 = vld [vmem:[%s3033_s1 + $0x118] sm:$0xff]  ;;  %v2008_v63 = vpack.i.bf16 %v2491_v55, %v2488_v51  ;;  %v2516_v2 = vld [vmem:[%s2242_s27 + $0xa8] sm:$0xff] }
  0x2d   : > { %1733 = vmatprep.subr.mxu1 %v752_v22  ;;  %1663 = vmatprep.subr.mxu0 %v715_v23  ;;  %v2519_v3 = vld [vmem:[%s2242_s27 + $0x91] sm:$0xff]  ;;  %v747_v8 = vld [vmem:[%s3033_s1 + $0x188] sm:$0xff]  ;;  %v746_v12 = vld [vmem:[%s3033_s1 + $0x180] sm:$0xff] }
  0x2e   : > { %1734 = vmatpush3.msra.mxu1 %v736_v27  ;;  %1664 = vmatpush3.msra.mxu0 %v699_v29  ;;  %v732_v4 = vld [vmem:[%s3033_s1 + $0x110] sm:$0xff]  ;;  %v731_v10 = vld [vmem:[%s3033_s1 + $0x108] sm:$0xff]  ;;  %v2018_v11 = vpack.i.bf16 %v2519_v3, %v2516_v2  ;;  %v2546_v15 = vld [vmem:[%s2242_s27 + $0x99] sm:$0xff] }
  0x2f   : > { %1969 = vrot.lane.b32.xlu0 %v1968_v1, %s2118_s20  ;;  %1735 = vmatprep.subr.mxu1 %v751_v36  ;;  %v2013_v1 = vpack.i.bf16 %v2497_v60, %v2491_v55  ;;  %v2543_v14 = vld [vmem:[%s2242_s27 + $0xb0] sm:$0xff]  ;;  %v2552_v19 = vld [vmem:[%s2242_s27 + $0x82] sm:$0xff] }
  0x30   : > { %1974 = vrot.lane.b32.xlu1 %v1973_v5, %s2118_s20  ;;  %1665 = vmatprep.subr.mxu0 %v714_v40  ;;  %v2525_v5 = vld [vmem:[%s2242_s27 + $0x7a] sm:$0xff]  ;;  %v2028_v21 = vpack.i.bf16 %v2546_v15, %v2543_v14  ;;  %v2033_v22 = vpack.i.bf16 %v2552_v19, %v2546_v15  ;;  %v2568_v27 = vld [vmem:[%s2242_s27 + $0x92] sm:$0xff]  ;;  %v2577_v36 = vld [vmem:[%s2242_s27 + $0xc8] sm:$0xff] }
  0x31   : > { %1736 = vmatpush3.msra.mxu1 %v735_v42  ;;  %1666 = vmatpush3.msra.mxu0 %v698_v43  ;;  %v2561_v23 = vld [vmem:[%s2242_s27 + $0xc0] sm:$0xff]  ;;  %v2580_v40 = vld [vmem:[%s2242_s27 + $0xb1] sm:$0xff] }
  0x32   : > { %1737 = vmatprep.subr.mxu1 %v750_v45  ;;  %1819 = vmatprep.subr.mxu0 %v2482_v46  ;;  %v2583_v42 = vld [vmem:[%s2242_s27 + $0x9a] sm:$0xff]  ;;  %v2048_v43 = vpack.i.bf16 %v2580_v40, %v2577_v36  ;;  %v2592_v45 = vld [vmem:[%s2242_s27 + $0xaa] sm:$0xff] }
  0x33   : > { %1979 = vrot.lane.b32.xlu0 %v1978_v13, %s2118_s20  ;;  %1738 = vmatpush3.msra.mxu1 %v734_v56  ;;  %v2023_v13 = vpack.i.bf16 %v2525_v5, %v2519_v3  ;;  %v2598_v56 = vld [vmem:[%s2242_s27 + $0xb2] sm:$0xff] }
  0x34   : > { %1984 = vrot.lane.b32.xlu1 %v1983_v16, %s2118_s20  ;;  %1739 = vmatprep.subr.mxu1 %v749_v61  ;;  %v730_v16 = vld [vmem:[%s3033_s1 + $0x100] sm:$0xff]  ;;  %v2601_v61 = vld [vmem:[%s2242_s27 + $0xc9] sm:$0xff] }
  0x35   : > { %1740 = vmatpush3.msra.mxu1 %v733_v62  ;;  %3039 = vst [vmem:[#allocation2_spill] sm:$0xff] %v2601_v61 }
  0x36   : > { %1741 = vmatprep.subr.mxu1 %v748_v0  ;;  %v2610_v0 = vld [vmem:[%s2242_s27 + $0xc2] sm:$0xff] }
  0x37   : > { %1989 = vrot.lane.b32.xlu0 %v1988_v26, %s2118_s20  ;;  %1742 = vmatpush3.msra.mxu1 %v732_v4  ;;  %v2564_v26 = vld [vmem:[%s2242_s27 + $0xa9] sm:$0xff]  ;;  %3040 = vst [vmem:[#allocation3_spill] sm:$0xff] %v2610_v0 }
  0x38   : > { %1994 = vrot.lane.b32.xlu1 %v1993_v31, %s2118_s20  ;;  %1743 = vmatprep.subr.mxu1 %v747_v8  ;;  %v2038_v29 = vpack.i.bf16 %v2564_v26, %v2561_v23  ;;  %v2043_v31 = vpack.i.bf16 %v2568_v27, %v2564_v26  ;;  %v2614_v4 = vld [vmem:[%s2242_s27 + $0xca] sm:$0xff]  ;;  %v1600_v8 = vld [vmem:[%s2242_s27 + $0xe1] sm:$0xff] }
  0x39   : > { %1744 = vmatpush3.msra.mxu1 %v731_v10  ;;  %3041 = vst [vmem:[#allocation4_spill] sm:$0xff] %v2614_v4 }
  0x3a   : > { %1745 = vmatprep.subr.mxu1 %v746_v12 }
  0x3b   : > { %1999 = vrot.lane.b32.xlu0 %v1998_v44, %s2118_s20  ;;  %1746 = vmatpush3.msra.mxu1 %v730_v16  ;;  %v2053_v44 = vpack.i.bf16 %v2583_v42, %v2580_v40  ;;  %v231_v16 = vld [vmem:[%s2242_s27] sm:$0xff] }
  0x3c   : > { %2004 = vrot.lane.b32.xlu1 %v2003_v50, %s2118_s20  ;;  %1859 = vmatprep.subr.mxu1 %v2482_v46  ;;  %v2595_v50 = vld [vmem:[%s2242_s27 + $0xc1] sm:$0xff] }
  0x3d   : > { %v2058_v62 = vpack.i.bf16 %v2592_v45, %v2595_v50 }
  0x3f   : > { %2009 = vrot.lane.b32.xlu0 %v2008_v63, %s2118_s20  ;;  %v2063_v63 = vpack.i.bf16 %v2598_v56, %v2601_v61 }
  0x40   : > { %2014 = vrot.lane.b32.xlu1 %v2013_v1, %s2118_s20  ;;  %v1599_v1 = vld [vmem:[%s2242_s27 + $0xd9] sm:$0xff] }
  0x41   : > { %v2068_v10 = vpack.i.bf16 %v2610_v0, %v1599_v1  ;;  %v232_v1 = vld [vmem:[%s2242_s27 + $0x8] sm:$0xff] }
  0x43   : > { %2019 = vrot.lane.b32.xlu0 %v2018_v11, %s2118_s20  ;;  %v2073_v11 = vpack.i.bf16 %v2614_v4, %v1600_v8  ;;  %v768_v8 = vld [vmem:[%s3033_s1 + $0x230] sm:$0xff] }
  0x44   : > { %2024 = vrot.lane.b32.xlu1 %v2023_v13, %s2118_s20  ;;  %v263_v13 = vld [vmem:[%s2242_s27 + $0x2] sm:$0xff] }
  0x47   : > { %2029 = vrot.lane.b32.xlu0 %v2028_v21, %s2118_s20 }
  0x48   : > { %2034 = vrot.lane.b32.xlu1 %v2033_v22, %s2118_s20 }
  0x4b   : > { %2039 = vrot.lane.b32.xlu0 %v2038_v29, %s2118_s20 }
  0x4c   : > { %2044 = vrot.lane.b32.xlu1 %v2043_v31, %s2118_s20 }
  0x4f   : > { %2049 = vrot.lane.b32.xlu0 %v2048_v43, %s2118_s20 }
  0x50   : > { %2054 = vrot.lane.b32.xlu1 %v2053_v44, %s2118_s20 }
  0x53   : > { %2059 = vrot.lane.b32.xlu0 %v2058_v62, %s2118_s20 }
  0x54   : > { %2064 = vrot.lane.b32.xlu1 %v2063_v63, %s2118_s20  ;;  %v264_v63 = vld [vmem:[%s2242_s27 + $0xa] sm:$0xff] }
  0x57   : > { %2069 = vrot.lane.b32.xlu0 %v2068_v10, %s2118_s20 }
  0x58   : > { %2074 = vrot.lane.b32.xlu1 %v2073_v11, %s2118_s20  ;;  %s1519_s20 = sshll.u32 %s3062_s13, 1 }
  0x59   : > { %s228_s10 = sadd.s32 %s1519_s20, %s2190_s29 }
  0x5a   : > { %s1520_s11 = sshll.u32 %s228_s10, 1 }
  0x5b   : > { %s230_s23 = scalar_lea.vmem %s3035_s3, %s1520_s11 }
  0x8d   : > { %v1920_v12 = vpop.permute.xlu0 %1919 }
  0x8e   : > { %v1922_v21 = vunpack.i.h.bf16 %v1920_v12  ;;  %v1921_v22 = vunpack.i.l.bf16 %v1920_v12  ;;  %v1930_v29 = vpop.permute.xlu1 %1929  ;;  %v767_v12 = vld [vmem:[%s3033_s1 + $0x228] sm:$0xff] }
  0x8f   : > { %v1931_v31 = vunpack.i.l.bf16 %v1930_v29  ;;  %v1932_v0 = vunpack.i.h.bf16 %v1930_v29  ;;  %v2643_v29 = vld [vmem:[%s3033_s1 + $0x220] sm:$0xff] }
  0x90   : > { %v650_v43 = vsel %vm633_vm0, %v263_v13, %v1921_v22  ;;  %v634_v44 = vsel %vm633_vm0, %v231_v16, %v1922_v21 }
  0x91   : > { %v1925_v62 = vpop.permute.xlu0 %1924  ;;  %882 = vmatprep.mubr.f32.mxu0 %v650_v43  ;;  %v652_v22 = vsel %vm633_vm0, %v2300_v41, %v1931_v31 }
  0x92   : > { %v1927_v10 = vunpack.i.h.bf16 %v1925_v62  ;;  %v1926_v11 = vunpack.i.l.bf16 %v1925_v62  ;;  %v1935_v4 = vpop.permute.xlu1 %1934  ;;  %883 = vmatmul.mubr.f32.vlgmr.msra.gmra.mxu0 %v634_v44 }
  0x93   : > { %1820 = vmatpush3.msra.mxu0 %v2482_v46  ;;  %v1936_v13 = vunpack.i.l.bf16 %v1935_v4  ;;  %v1937_v61 = vunpack.i.h.bf16 %v1935_v4 }
  0x94   : > { %v651_v16 = vsel %vm633_vm0, %v264_v63, %v1926_v11  ;;  %v635_v21 = vsel %vm633_vm0, %v232_v1, %v1927_v10  ;;  %1821 = vmatprep.subr.mxu0 %v768_v8  ;;  %v636_v1 = vsel %vm633_vm0, %v2255_v24, %v1932_v0  ;;  %v2658_v24 = vld [vmem:[%s3033_s1 + $0x218] sm:$0xff] }
  0x95   : > { %v1940_v43 = vpop.permute.xlu0 %1939  ;;  %887 = vmatprep.mubr.f32.mxu0 %v651_v16  ;;  %1822 = vmatpush3.msra.mxu0 %v768_v8  ;;  %v653_v10 = vsel %vm633_vm0, %v2324_v49, %v1936_v13  ;;  %v637_v13 = vsel %vm633_vm0, %v2269_v30, %v1937_v61 }
  0x96   : > { %v1942_v44 = vunpack.i.h.bf16 %v1940_v43  ;;  %v1945_v62 = vpop.permute.xlu1 %1944  ;;  %888 = vmatmul.mubr.f32.gmra.mxu0 %v635_v21  ;;  %1823 = vmatprep.subr.mxu0 %v767_v12  ;;  %v1941_v41 = vunpack.i.l.bf16 %v1940_v43 }
  0x97   : > { %v1947_v63 = vunpack.i.h.bf16 %v1945_v62  ;;  %892 = vmatprep.mubr.f32.mxu0 %v652_v22  ;;  %1824 = vmatpush3.msra.mxu0 %v767_v12  ;;  %v1946_v21 = vunpack.i.l.bf16 %v1945_v62 }
  0x98   : > { %v682_v31 = vsel %vm633_vm0, %v2265_v28, %v1942_v44  ;;  %1825 = vmatprep.subr.mxu0 %v2643_v29  ;;  %v654_v43 = vsel %vm633_vm0, %v2339_v54, %v1941_v41 }
  0x99   : > { %v1950_v11 = vpop.permute.xlu0 %1949  ;;  %1027 = vmatprep.mubr.f32.mxu1 %v682_v31  ;;  %v666_v4 = vsel %vm633_vm0, %v2258_v25, %v1947_v63  ;;  %1826 = vmatpush3.msra.mxu0 %v2643_v29 }
  0x9a   : > { %v1952_v0 = vunpack.i.h.bf16 %v1950_v11  ;;  %v1955_v16 = vpop.permute.xlu1 %1954  ;;  %893 = vmatmul.mubr.f32.gmra.mxu0 %v636_v1  ;;  %1028 = vmatmul.mubr.f32.vlgmr.msra.gmra.mxu1 %v666_v4  ;;  %v1951_v25 = vunpack.i.l.bf16 %v1950_v11  ;;  %v638_v1 = vsel %vm633_vm0, %v2265_v28, %v1946_v21  ;;  %v763_v21 = vld [vmem:[%s3033_s1 + $0x208] sm:$0xff] }
  0x9b   : > { %v1957_v49 = vunpack.i.h.bf16 %v1955_v16  ;;  %897 = vmatprep.mubr.f32.mxu0 %v653_v10  ;;  %1867 = vmatpush3.msra.mxu1 %v2482_v46  ;;  %v1956_v46 = vunpack.i.l.bf16 %v1955_v16 }
  0x9c   : > { %v683_v22 = vsel %vm633_vm0, %v2277_v33, %v1952_v0  ;;  %1860 = vmatprep.subr.mxu1 %v768_v8  ;;  %1827 = vmatprep.subr.mxu0 %v2658_v24  ;;  %v655_v31 = vsel %vm633_vm0, %v2354_v59, %v1951_v25 }
  0x9d   : > { %v1960_v44 = vpop.permute.xlu0 %1959  ;;  %1032 = vmatprep.mubr.f32.mxu1 %v683_v22  ;;  %v667_v62 = vsel %vm633_vm0, %v2274_v32, %v1957_v49  ;;  %1868 = vmatpush3.msra.mxu1 %v768_v8  ;;  %v764_v32 = vld [vmem:[%s3033_s1 + $0x210] sm:$0xff] }
  0x9e   : > { %v1962_v63 = vunpack.i.h.bf16 %v1960_v44  ;;  %v1965_v30 = vpop.permute.xlu1 %1964  ;;  %898 = vmatmul.mubr.f32.gmra.mxu0 %v637_v13  ;;  %1033 = vmatmul.mubr.f32.gmra.mxu1 %v667_v62  ;;  %v1961_v54 = vunpack.i.l.bf16 %v1960_v44  ;;  %v762_v62 = vld [vmem:[%s3033_s1 + $0x200] sm:$0xff] }
  0x9f   : > { %v1967_v61 = vunpack.i.h.bf16 %v1965_v30  ;;  %902 = vmatprep.mubr.f32.mxu0 %v654_v43  ;;  %1861 = vmatprep.subr.mxu1 %v767_v12  ;;  %v1966_v4 = vunpack.i.l.bf16 %v1965_v30 }
  0xa0   : > { %v684_v41 = vsel %vm633_vm0, %v2291_v38, %v1962_v63  ;;  %1869 = vmatpush3.msra.mxu1 %v767_v12  ;;  %1828 = vmatpush3.msra.mxu0 %v2658_v24  ;;  %v639_v12 = vsel %vm633_vm0, %v2277_v33, %v1956_v46 }
  0xa1   : > { %v1970_v8 = vpop.permute.xlu0 %1969  ;;  %1037 = vmatprep.mubr.f32.mxu1 %v684_v41  ;;  %v668_v28 = vsel %vm633_vm0, %v2294_v39, %v1967_v61  ;;  %1862 = vmatprep.subr.mxu1 %v2643_v29  ;;  %v656_v39 = vsel %vm633_vm0, %v2396_v9, %v1961_v54 }
  0xa2   : > { %v1972_v10 = vunpack.i.h.bf16 %v1970_v8  ;;  %v1975_v11 = vpop.permute.xlu1 %1974  ;;  %903 = vmatmul.mubr.f32.gmra.mxu0 %v638_v1  ;;  %1038 = vmatmul.mubr.f32.gmra.mxu1 %v668_v28  ;;  %v1971_v0 = vunpack.i.l.bf16 %v1970_v8 }
  0xa3   : > { %v1977_v59 = vunpack.i.h.bf16 %v1975_v11  ;;  %907 = vmatprep.mubr.f32.mxu0 %v655_v31  ;;  %1829 = vmatprep.subr.mxu0 %v764_v32  ;;  %v1976_v22 = vunpack.i.l.bf16 %v1975_v11 }
  0xa4   : > { %v685_v16 = vsel %vm633_vm0, %v2318_v47, %v1972_v10  ;;  %1870 = vmatpush3.msra.mxu1 %v2643_v29  ;;  %1830 = vmatpush3.msra.mxu0 %v764_v32  ;;  %v640_v29 = vsel %vm633_vm0, %v2291_v38, %v1966_v4 }
  0xa5   : > { %v1980_v49 = vpop.permute.xlu0 %1979  ;;  %1042 = vmatprep.mubr.f32.mxu1 %v685_v16  ;;  %v669_v33 = vsel %vm633_vm0, %v2321_v48, %v1977_v59  ;;  %1863 = vmatprep.subr.mxu1 %v2658_v24  ;;  %v657_v48 = vsel %vm633_vm0, %v2429_v20, %v1971_v0  ;;  %v641_v20 = vsel %vm633_vm0, %v2318_v47, %v1976_v22 }
  0xa6   : > { %v1982_v13 = vunpack.i.h.bf16 %v1980_v49  ;;  %v1985_v25 = vpop.permute.xlu1 %1984  ;;  %908 = vmatmul.mubr.f32.gmra.mxu0 %v639_v12  ;;  %1043 = vmatmul.mubr.f32.gmra.mxu1 %v669_v33  ;;  %v1981_v43 = vunpack.i.l.bf16 %v1980_v49 }
  0xa7   : > { %v1987_v9 = vunpack.i.h.bf16 %v1985_v25  ;;  %912 = vmatprep.mubr.f32.mxu0 %v656_v39  ;;  %1831 = vmatprep.subr.mxu0 %v763_v21  ;;  %v1986_v61 = vunpack.i.l.bf16 %v1985_v25 }
  0xa8   : > { %v686_v44 = vsel %vm633_vm0, %v2333_v52, %v1982_v13  ;;  %1871 = vmatpush3.msra.mxu1 %v2658_v24  ;;  %1832 = vmatpush3.msra.mxu0 %v763_v21  ;;  %v658_v41 = vsel %vm633_vm0, %v2462_v37, %v1981_v43 }
  0xa9   : > { %v1990_v63 = vpop.permute.xlu0 %1989  ;;  %1047 = vmatprep.mubr.f32.mxu1 %v686_v44  ;;  %v670_v38 = vsel %vm633_vm0, %v2336_v53, %v1987_v9  ;;  %1864 = vmatprep.subr.mxu1 %v764_v32  ;;  %v642_v11 = vsel %vm633_vm0, %v2333_v52, %v1986_v61 }
  0xaa   : > { %v1992_v30 = vunpack.i.h.bf16 %v1990_v63  ;;  %v1995_v46 = vpop.permute.xlu1 %1994  ;;  %913 = vmatmul.mubr.f32.gmra.mxu0 %v640_v29  ;;  %1048 = vmatmul.mubr.f32.gmra.mxu1 %v670_v38  ;;  %v1991_v24 = vunpack.i.l.bf16 %v1990_v63 }
  0xab   : > { %v1997_v1 = vunpack.i.h.bf16 %v1995_v46  ;;  %917 = vmatprep.mubr.f32.mxu0 %v657_v48  ;;  %1833 = vmatprep.subr.mxu0 %v762_v62  ;;  %v1996_v47 = vunpack.i.l.bf16 %v1995_v46 }
  0xac   : > { %v687_v54 = vsel %vm633_vm0, %v2348_v57, %v1992_v30  ;;  %1872 = vmatpush3.msra.mxu1 %v764_v32  ;;  %1834 = vmatpush3.msra.mxu0 %v762_v62  ;;  %v659_v4 = vsel %vm633_vm0, %v2497_v60, %v1991_v24 }
  0xad   : > { %v2000_v53 = vpop.permute.xlu0 %1999  ;;  %1052 = vmatprep.mubr.f32.mxu1 %v687_v54  ;;  %v671_v31 = vsel %vm633_vm0, %v2351_v58, %v1997_v1  ;;  %1865 = vmatprep.subr.mxu1 %v763_v21  ;;  %v643_v39 = vsel %vm633_vm0, %v2348_v57, %v1996_v47 }
  0xae   : > { %v2002_v8 = vunpack.i.h.bf16 %v2000_v53  ;;  %v2005_v28 = vpop.permute.xlu1 %2004  ;;  %918 = vmatmul.mubr.f32.gmra.mxu0 %v641_v20  ;;  %1053 = vmatmul.mubr.f32.gmra.mxu1 %v671_v31  ;;  %v2001_v37 = vunpack.i.l.bf16 %v2000_v53 }
  0xaf   : > { %v2007_v10 = vunpack.i.h.bf16 %v2005_v28  ;;  %922 = vmatprep.mubr.f32.mxu0 %v658_v41  ;;  %1873 = vmatpush3.msra.mxu1 %v763_v21  ;;  %v2006_v52 = vunpack.i.l.bf16 %v2005_v28 }
  0xb0   : > { %v688_v32 = vsel %vm633_vm0, %v2387_v6, %v2002_v8  ;;  %1866 = vmatprep.subr.mxu1 %v762_v62  ;;  %v660_v49 = vsel %vm633_vm0, %v2525_v5, %v2001_v37 }
  0xb1   : > { %v2010_v58 = vpop.permute.xlu0 %2009  ;;  %1057 = vmatprep.mubr.f32.mxu1 %v688_v32  ;;  %v672_v59 = vsel %vm633_vm0, %v2390_v7, %v2007_v10  ;;  %1874 = vmatpush3.msra.mxu1 %v762_v62  ;;  %v644_v57 = vsel %vm633_vm0, %v2387_v6, %v2006_v52 }
  0xb2   : > { %v2012_v12 = vunpack.i.h.bf16 %v2010_v58  ;;  %v2015_v0 = vpop.permute.xlu1 %2014  ;;  %923 = vmatmul.mubr.f32.gmra.mxu0 %v642_v11  ;;  %1058 = vmatmul.mubr.f32.gmra.mxu1 %v672_v59  ;;  %v2011_v21 = vunpack.i.l.bf16 %v2010_v58 }
  0xb3   : > { %v2017_v16 = vunpack.i.h.bf16 %v2015_v0  ;;  %927 = vmatprep.mubr.f32.mxu0 %v659_v4  ;;  %v2016_v22 = vunpack.i.l.bf16 %v2015_v0 }
  0xb4   : > { %v689_v60 = vsel %vm633_vm0, %v2420_v17, %v2012_v12  ;;  %v661_v5 = vsel %vm633_vm0, %v2552_v19, %v2011_v21 }
  0xb5   : > { %v2020_v33 = vpop.permute.xlu0 %2019  ;;  %1062 = vmatprep.mubr.f32.mxu1 %v689_v60  ;;  %v673_v7 = vsel %vm633_vm0, %v2423_v18, %v2017_v16  ;;  %v645_v6 = vsel %vm633_vm0, %v2420_v17, %v2016_v22 }
  0xb6   : > { %v2022_v13 = vunpack.i.h.bf16 %v2020_v33  ;;  %v2025_v25 = vpop.permute.xlu1 %2024  ;;  %928 = vmatmul.mubr.f32.gmra.mxu0 %v643_v39  ;;  %1063 = vmatmul.mubr.f32.gmra.mxu1 %v673_v7  ;;  %v2021_v29 = vunpack.i.l.bf16 %v2020_v33 }
  0xb7   : > { %v2027_v9 = vunpack.i.h.bf16 %v2025_v25  ;;  %932 = vmatprep.mubr.f32.mxu0 %v660_v49  ;;  %v2026_v63 = vunpack.i.l.bf16 %v2025_v25 }
  0xb8   : > { %v690_v43 = vsel %vm633_vm0, %v2453_v34, %v2022_v13  ;;  %v662_v61 = vsel %vm633_vm0, %v2568_v27, %v2021_v29  ;;  %v1583_v13 = vld [vmem:[%s2242_s27 + $0xd8] sm:$0xff]  ;;  %v1584_v29 = vld [vmem:[%s2242_s27 + $0xe0] sm:$0xff] }
  0xb9   : > { %v2030_v44 = vpop.permute.xlu0 %2029  ;;  %1067 = vmatprep.mubr.f32.mxu1 %v690_v43  ;;  %v674_v18 = vsel %vm633_vm0, %v2456_v35, %v2027_v9  ;;  %v646_v17 = vsel %vm633_vm0, %v2453_v34, %v2026_v63  ;;  %v1605_v63 = vld [vmem:[%s2242_s27 + $0x62] sm:$0xff] }
  0xba   : > { %v2032_v48 = vunpack.i.h.bf16 %v2030_v44  ;;  %v2035_v62 = vpop.permute.xlu1 %2034  ;;  %933 = vmatmul.mubr.f32.gmra.mxu0 %v644_v57  ;;  %1068 = vmatmul.mubr.f32.gmra.mxu1 %v674_v18  ;;  %v2031_v30 = vunpack.i.l.bf16 %v2030_v44  ;;  %v1603_v44 = vld [vmem:[%s2242_s27 + $0x4a] sm:$0xff]  ;;  %v3042_v18 = vld [vmem:[#allocation2_spill] sm:$0xff] }
  0xbb   : > { %v2037_v38 = vunpack.i.h.bf16 %v2035_v62  ;;  %937 = vmatprep.mubr.f32.mxu0 %v661_v5  ;;  %v2036_v54 = vunpack.i.l.bf16 %v2035_v62  ;;  %v1602_v5 = vld [vmem:[%s2242_s27 + $0x3a] sm:$0xff]  ;;  %v1604_v62 = vld [vmem:[%s2242_s27 + $0x52] sm:$0xff] }
  0xbc   : > { %v691_v46 = vsel %vm633_vm0, %v2488_v51, %v2032_v48  ;;  %v663_v8 = vsel %vm633_vm0, %v2583_v42, %v2031_v30  ;;  %v3044_v30 = vld [vmem:[#allocation4_spill] sm:$0xff] }
  0xbd   : > { %v2040_v1 = vpop.permute.xlu0 %2039  ;;  %1072 = vmatprep.mubr.f32.mxu1 %v691_v46  ;;  %v675_v35 = vsel %vm633_vm0, %v2491_v55, %v2037_v38  ;;  %v647_v34 = vsel %vm633_vm0, %v2488_v51, %v2036_v54  ;;  %v1607_v38 = vld [vmem:[%s2242_s27 + $0x7a] sm:$0xff] }
  0xbe   : > { %v2042_v20 = vunpack.i.h.bf16 %v2040_v1  ;;  %v2045_v24 = vpop.permute.xlu1 %2044  ;;  %938 = vmatmul.mubr.f32.gmra.mxu0 %v645_v6  ;;  %1073 = vmatmul.mubr.f32.gmra.mxu1 %v675_v35  ;;  %v2041_v53 = vunpack.i.l.bf16 %v2040_v1  ;;  %v3043_v6 = vld [vmem:[#allocation3_spill] sm:$0xff] }
  0xbf   : > { %v2047_v41 = vunpack.i.h.bf16 %v2045_v24  ;;  %942 = vmatprep.mubr.f32.mxu0 %v662_v61  ;;  %v2046_v11 = vunpack.i.l.bf16 %v2045_v24 }
  0xc0   : > { %v692_v31 = vsel %vm633_vm0, %v2516_v2, %v2042_v20  ;;  %v664_v58 = vsel %vm633_vm0, %v2592_v45, %v2041_v53 }
  0xc1   : > { %v2050_v28 = vpop.permute.xlu0 %2049  ;;  %1077 = vmatprep.mubr.f32.mxu1 %v692_v31  ;;  %v676_v55 = vsel %vm633_vm0, %v2519_v3, %v2047_v41  ;;  %v648_v21 = vsel %vm633_vm0, %v2516_v2, %v2046_v11 }
  0xc2   : > { %v2052_v47 = vunpack.i.h.bf16 %v2050_v28  ;;  %v2055_v10 = vpop.permute.xlu1 %2054  ;;  %943 = vmatmul.mubr.f32.gmra.mxu0 %v646_v17  ;;  %1078 = vmatmul.mubr.f32.gmra.mxu1 %v676_v55  ;;  %v2051_v32 = vunpack.i.l.bf16 %v2050_v28 }
  0xc3   : > { %v2057_v37 = vunpack.i.h.bf16 %v2055_v10  ;;  %947 = vmatprep.mubr.f32.mxu0 %v663_v8  ;;  %v2056_v16 = vunpack.i.l.bf16 %v2055_v10 }
  0xc4   : > { %v693_v4 = vsel %vm633_vm0, %v2543_v14, %v2052_v47 }
  0xc5   : > { %v2060_v59 = vpop.permute.xlu0 %2059  ;;  %1082 = vmatprep.mubr.f32.mxu1 %v693_v4  ;;  %v677_v3 = vsel %vm633_vm0, %v2546_v15, %v2057_v37  ;;  %v665_v15 = vsel %vm633_vm0, %v2598_v56, %v2051_v32 }
  0xc6   : > { %v2062_v12 = vunpack.i.h.bf16 %v2060_v59  ;;  %v2061_v0 = vunpack.i.l.bf16 %v2060_v59  ;;  %948 = vmatmul.mubr.f32.gmra.mxu0 %v647_v34  ;;  %1083 = vmatmul.mubr.f32.gmra.mxu1 %v677_v3  ;;  %v2065_v52 = vpop.permute.xlu1 %2064 }
  0xc7   : > { %v2067_v51 = vunpack.i.h.bf16 %v2065_v52  ;;  %v2066_v39 = vunpack.i.l.bf16 %v2065_v52  ;;  %952 = vmatprep.mubr.f32.mxu0 %v664_v58 }
  0xc8   : > { %v694_v60 = vsel %vm633_vm0, %v2561_v23, %v2061_v0  ;;  %v678_v49 = vsel %vm633_vm0, %v2564_v26, %v2062_v12  ;;  %v649_v26 = vsel %vm633_vm0, %v2543_v14, %v2056_v16 }
  0xc9   : > { %1087 = vmatprep.mubr.f32.mxu1 %v694_v60  ;;  %v2070_v33 = vpop.permute.xlu0 %2069  ;;  %v695_v7 = vsel %vm633_vm0, %v2577_v36, %v2066_v39  ;;  %v679_v22 = vsel %vm633_vm0, %v2580_v40, %v2067_v51  ;;  %v1601_v36 = vld [vmem:[%s2242_s27 + $0x32] sm:$0xff] }
  0xca   : > { %953 = vmatmul.mubr.f32.gmra.mxu0 %v648_v21  ;;  %1088 = vmatmul.mubr.f32.gmra.mxu1 %v678_v49  ;;  %v2071_v2 = vunpack.i.l.bf16 %v2070_v33  ;;  %v2075_v25 = vpop.permute.xlu1 %2074  ;;  %v2072_v23 = vunpack.i.h.bf16 %v2070_v33 }
  0xcb   : > { %957 = vmatprep.mubr.f32.mxu0 %v665_v15  ;;  %1092 = vmatprep.mubr.f32.mxu1 %v695_v7  ;;  %v2076_v9 = vunpack.i.l.bf16 %v2075_v25  ;;  %v2077_v43 = vunpack.i.h.bf16 %v2075_v25 }
  0xcc   : > { %v696_v57 = vsel %vm633_vm0, %v1583_v13, %v2071_v2  ;;  %v680_v14 = vsel %vm633_vm0, %v2595_v50, %v2072_v23  ;;  %v1606_v50 = vld [vmem:[%s2242_s27 + $0x6a] sm:$0xff] }
  0xcd   : > { %v697_v40 = vsel %vm633_vm0, %v1584_v29, %v2076_v9  ;;  %v681_v48 = vsel %vm633_vm0, %v3042_v18, %v2077_v43 }
  0xce   : > { %958 = vmatmul.mubr.f32.gmra.mxu0 %v649_v26  ;;  %1093 = vmatmul.mubr.f32.gmra.mxu1 %v679_v22 }
  0xcf   : > { %1097 = vmatprep.mubr.f32.mxu1 %v696_v57  ;;  %1835 = vmatprep.mubr.msk.f32.mxu0 %vm633_vm0, %v1601_v36 }
  0xd2   : > { %1098 = vmatmul.mubr.f32.gmra.mxu1 %v680_v14  ;;  %1836 = vmatmul.mubr.msk.f32.vlgmr.msra.gmra.mxu0 %vm633_vm0, %v1602_v5 }
  0xd3   : > { %1102 = vmatprep.mubr.f32.mxu1 %v697_v40  ;;  %1838 = vmatprep.mubr.msk.f32.mxu0 %vm633_vm0, %v1603_v44 }
  0xd6   : > { %1103 = vmatmul.mubr.f32.gmra.mxu1 %v681_v48  ;;  %1839 = vmatmul.mubr.msk.f32.gmra.mxu0 %vm633_vm0, %v1604_v62 }
  0xd7   : > { %1841 = vmatprep.mubr.msk.f32.mxu0 %vm633_vm0, %v1605_v63  ;;  %1847 = vmatprep.mubr.msk.f32.mxu1 %vm633_vm0, %v2568_v27  ;;  %v1615_v27 = vld [vmem:[%s2242_s27 + $0xda] sm:$0xff] }
  0xda   : > { %1842 = vmatmul.mubr.msk.f32.gmra.mxu0 %vm633_vm0, %v1606_v50  ;;  %1848 = vmatmul.mubr.msk.f32.vlgmr.msra.gmra.mxu1 %vm633_vm0, %v2583_v42  ;;  %v1616_v42 = vld [vmem:[%s2242_s27 + $0xe2] sm:$0xff]  ;;  %s1515_s27 = sshll.u32 %s2100_s12, 3 }
  0xdb   : > { %1844 = vmatprep.mubr.msk.f32.mxu0 %vm633_vm0, %v1607_v38  ;;  %1850 = vmatprep.mubr.msk.f32.mxu1 %vm633_vm0, %v2592_v45  ;;  %p215_p7 = scmp.lt.s32.totalorder %s1515_s27, 15 }
  0xdd   : > { %s3064_s27 = smov (!%p215_p7, %s1515_s27), 15 }
  0xde   : > { %1845 = vmatmul.mubr.msk.f32.gmra.mxu0 %vm633_vm0, %v2552_v19  ;;  %1851 = vmatmul.mubr.msk.f32.gmra.mxu1 %vm633_vm0, %v2598_v56  ;;  %s1516_s30 = sshll.u32 %s3064_s27, 1 }
  0xdf   : > { %1853 = vmatprep.mubr.msk.f32.mxu1 %vm633_vm0, %v3043_v6  ;;  %s219_s12 = sadd.s32 %s1517_s4, %s1516_s30 }
  0xe0   : > { %s1518_s5 = sshll.u32 %s219_s12, 3 }
  0xe1   : > { %s2907_s9 = scalar_lea.vmem %s3034_s2, %s1518_s5 }
  0xe2   : > { %1854 = vmatmul.mubr.msk.f32.gmra.mxu1 %vm633_vm0, %v3044_v30 }
  0xe3   : > { %1856 = vmatprep.mubr.msk.f32.mxu1 %vm633_vm0, %v1615_v27 }
  0xe6   : > { %1857 = vmatmul.mubr.msk.f32.gmra.mxu1 %vm633_vm0, %v1616_v42 }
 0x152   : > { %v2818_v46 = vpop.f32.mrf.mxu0 }
 0x154   : > { %v2820_v45 = vpop.f32.mrf.mxu0 }
 0x155   : > { %v1669_v42 = vadd.f32 %v2820_v45, %v2818_v46 }
 0x156   : > { %v2822_v19 = vpop.f32.mrf.mxu0 }
 0x158   : > { %v2824_v61 = vpop.f32.mrf.mxu0 }
 0x159   : > { %v1672_v6 = vadd.f32 %v2824_v61, %v2822_v19 }
 0x15a   : > { %v2826_v56 = vpop.f32.mrf.mxu0  ;;  %v1747_v1 = vpop.f32.mrf.mxu1 }
 0x15c   : > { %v2828_v35 = vpop.f32.mrf.mxu0  ;;  %v1748_v20 = vpop.f32.mrf.mxu1 }
 0x15d   : > { %v1749_v63 = vadd.f32 %v1748_v20, %v1747_v1  ;;  %v1675_v1 = vadd.f32 %v2828_v35, %v2826_v56 }
 0x15e   : > { %v2830_v24 = vpop.f32.mrf.mxu0  ;;  %v1750_v54 = vpop.f32.mrf.mxu1 }
 0x15f   : > { %v1030_v45 = vadd.f32 %v1749_v63, %v1669_v42 }
 0x160   : > { %v2832_v41 = vpop.f32.mrf.mxu0  ;;  %v1751_v17 = vpop.f32.mrf.mxu1 }
 0x161   : > { %v1752_v62 = vadd.f32 %v1751_v17, %v1750_v54  ;;  %v1678_v20 = vadd.f32 %v2832_v41, %v2830_v24 }
 0x162   : > { %v2834_v53 = vpop.f32.mrf.mxu0  ;;  %v1753_v31 = vpop.f32.mrf.mxu1 }
 0x163   : > { %v1035_v54 = vadd.f32 %v1752_v62, %v1672_v6 }
 0x164   : > { %v2836_v8 = vpop.f32.mrf.mxu0  ;;  %v1754_v28 = vpop.f32.mrf.mxu1 }
 0x165   : > { %v1755_v27 = vadd.f32 %v1754_v28, %v1753_v31  ;;  %v1681_v19 = vadd.f32 %v2836_v8, %v2834_v53 }
 0x166   : > { %v2838_v55 = vpop.f32.mrf.mxu0  ;;  %v1756_v47 = vpop.f32.mrf.mxu1 }
 0x167   : > { %v1040_v41 = vadd.f32 %v1755_v27, %v1675_v1 }
 0x168   : > { %v2840_v10 = vpop.f32.mrf.mxu0  ;;  %v1757_v11 = vpop.f32.mrf.mxu1 }
 0x169   : > { %v1758_v30 = vadd.f32 %v1757_v11, %v1756_v47  ;;  %v1684_v56 = vadd.f32 %v2840_v10, %v2838_v55 }
 0x16a   : > { %v2842_v37 = vpop.f32.mrf.mxu0  ;;  %v1759_v34 = vpop.f32.mrf.mxu1 }
 0x16b   : > { %v1045_v24 = vadd.f32 %v1758_v30, %v1678_v20 }
 0x16c   : > { %v2844_v32 = vpop.f32.mrf.mxu0  ;;  %v1760_v4 = vpop.f32.mrf.mxu1 }
 0x16d   : > { %v1687_v53 = vadd.f32 %v2844_v32, %v2842_v37 }
 0x16e   : > { %v2846_v58 = vpop.f32.mrf.mxu0  ;;  %v1762_v59 = vpop.f32.mrf.mxu1 }
 0x170   : > { %v2848_v3 = vpop.f32.mrf.mxu0  ;;  %v1763_v12 = vpop.f32.mrf.mxu1 }
 0x171   : > { %v1764_v61 = vadd.f32 %v1763_v12, %v1762_v59 }
 0x172   : > { %v2850_v0 = vpop.f32.mrf.mxu0  ;;  %v1765_v52 = vpop.f32.mrf.mxu1 }
 0x174   : > { %v2852_v16 = vpop.f32.mrf.mxu0  ;;  %v1766_v51 = vpop.f32.mrf.mxu1 }
 0x175   : > { %v1767_v17 = vadd.f32 %v1766_v51, %v1765_v52  ;;  %v1693_v10 = vadd.f32 %v2852_v16, %v2850_v0  ;;  %v1055_v51 = vadd.f32 %v1764_v61, %v1684_v56 }
 0x176   : > { %v2854_v39 = vpop.f32.mrf.mxu0  ;;  %v1768_v21 = vpop.f32.mrf.mxu1 }
 0x178   : > { %v2856_v60 = vpop.f32.mrf.mxu0  ;;  %v1769_v49 = vpop.f32.mrf.mxu1 }
 0x179   : > { %v1770_v8 = vadd.f32 %v1769_v49, %v1768_v21  ;;  %v1696_v37 = vadd.f32 %v2856_v60, %v2854_v39  ;;  %v2923_v21 = vadd.f32 %v1767_v17, %v1687_v53 }
 0x17a   : > { %v2858_v15 = vpop.f32.mrf.mxu0  ;;  %v1771_v33 = vpop.f32.mrf.mxu1 }
 0x17c   : > { %v2860_v7 = vpop.f32.mrf.mxu0  ;;  %v1772_v13 = vpop.f32.mrf.mxu1 }
 0x17d   : > { %v1773_v28 = vadd.f32 %v1772_v13, %v1771_v33 }
 0x17e   : > { %v2862_v2 = vpop.f32.mrf.mxu0  ;;  %v1774_v25 = vpop.f32.mrf.mxu1 }
 0x17f   : > { %v1070_v39 = vadd.f32 %v1773_v28, %v1693_v10 }
 0x180   : > { %v2865_v23 = vpop.f32.mrf.mxu0  ;;  %v1775_v26 = vpop.f32.mrf.mxu1 }
 0x181   : > { %v1776_v59 = vadd.f32 %v1775_v26, %v1774_v25  ;;  %v1702_v26 = vadd.f32 %v2865_v23, %v2862_v2 }
 0x182   : > { %v2867_v22 = vpop.f32.mrf.mxu0  ;;  %v1777_v9 = vpop.f32.mrf.mxu1 }
 0x184   : > { %v2869_v57 = vpop.f32.mrf.mxu0  ;;  %v1778_v36 = vpop.f32.mrf.mxu1 }
 0x185   : > { %v1779_v12 = vadd.f32 %v1778_v36, %v1777_v9  ;;  %v1705_v9 = vadd.f32 %v2869_v57, %v2867_v22 }
 0x186   : > { %v2871_v29 = vpop.f32.mrf.mxu0  ;;  %v1780_v43 = vpop.f32.mrf.mxu1 }
 0x188   : > { %v2873_v14 = vpop.f32.mrf.mxu0  ;;  %v1781_v5 = vpop.f32.mrf.mxu1 }
 0x189   : > { %v1708_v36 = vadd.f32 %v2873_v14, %v2871_v29 }
 0x18a   : > { %v2876_v40 = vpop.f32.mrf.mxu0  ;;  %v2878_v44 = vpop.f32.mrf.mxu1 }
 0x18b   : > { %3045 = vst [vmem:[#allocation2_spill] sm:$0xff] %v2876_v40  ;;  %v1761_v40 = vadd.f32 %v1760_v4, %v1759_v34  ;;  %v1690_v4 = vadd.f32 %v2848_v3, %v2846_v58  ;;  %v1699_v58 = vadd.f32 %v2860_v7, %v2858_v15  ;;  %v1782_v3 = vadd.f32 %v1781_v5, %v1780_v43 }
 0x18c   : > { %v2880_v18 = vpop.f32.mrf.mxu0  ;;  %v2882_v48 = vpop.f32.mrf.mxu1  ;;  %v1075_v15 = vadd.f32 %v1776_v59, %v1696_v37 }
 0x18d   : > { %3046 = vst [vmem:[#allocation3_spill] sm:$0xff] %v2880_v18  ;;  %3047 = vst [vmem:[#allocation4_spill] sm:$0xff] %v2882_v48  ;;  %v1050_v34 = vadd.f32 %v1761_v40, %v1681_v19  ;;  %v1065_v60 = vadd.f32 %v1770_v8, %v1690_v4  ;;  %v1080_v7 = vadd.f32 %v1779_v12, %v1699_v58 }
 0x18e   : > { %v2884_v50 = vpop.f32.mrf.mxu0  ;;  %v2886_v38 = vpop.f32.mrf.mxu1  ;;  %v1085_v57 = vadd.f32 %v1782_v3, %v1702_v26 }
 0x190   : > { %v2892_v18 = vpop.f32.mrf.mxu0  ;;  %v2894_v48 = vpop.f32.mrf.mxu1 }
 0x191   : > { %v1714_v59 = vadd.f32 %v2892_v18, %v2884_v50 }
 0x192   : > { %v2902_v31 = vpop.f32.mrf.mxu1  ;;  %v1837_v46 = vpop.f32.mrf.mxu0 }
 0x193   : > { %v1180_v35 = vadd.f32 %v1837_v46, %v1035_v54  ;;  %v1788_v54 = vadd.f32 %v2894_v48, %v2886_v38 }
 0x194   : > { %v2913_v47 = vpop.f32.mrf.mxu1  ;;  %v1174_v11 = vpop.f32.mrf.mxu0  ;;  %v3048_v1 = vld [vmem:[#allocation4_spill] sm:$0xff] }
 0x195   : > { %1254 = vst.msk [vmem:[%s2907_s9 + $0x8] sm:$0xff] %vm633_vm0, %v1180_v35  ;;  %v1175_v55 = vadd.f32 %v1174_v11, %v1030_v45  ;;  %v1307_v13 = vmul.f32 %v1180_v35, %v1180_v35  ;;  %v1270_v43 = vsel %vm633_vm0, %v1180_v35, 0.0  ;;  %v1785_v20 = vadd.f32 %v3048_v1, %v2878_v44 }
 0x196   : > { %v1792_v32 = vpop.f32.mrf.mxu1  ;;  %v1840_v52 = vpop.f32.mrf.mxu0  ;;  %v1095_v18 = vadd.f32 %v1788_v54, %v1708_v36  ;;  %v1791_v50 = vadd.f32 %v2913_v47, %v2902_v31  ;;  %v3050_v31 = vld [vmem:[#allocation3_spill] sm:$0xff] }
 0x197   : > { %1253 = vst.msk [vmem:[%s2907_s9] sm:$0xff] %vm633_vm0, %v1175_v55  ;;  %v1306_v49 = vmul.f32 %v1175_v55, %v1175_v55  ;;  %v1190_v33 = vadd.f32 %v1840_v52, %v1045_v24  ;;  %v1269_v0 = vsel %vm633_vm0, %v1175_v55, 0.0  ;;  %v1323_v6 = vsel %vm633_vm0, %v1307_v13, 0.0 }
 0x198   : > { %v1793_v16 = vpop.f32.mrf.mxu1  ;;  %v1184_v25 = vpop.f32.mrf.mxu0  ;;  %v1271_v2 = vadd.f32 %v1270_v43, %v1269_v0  ;;  %v1090_v10 = vadd.f32 %v1785_v20, %v1705_v9  ;;  %v3049_v9 = vld [vmem:[#allocation2_spill] sm:$0xff] }
 0x199   : > { %1256 = vst.msk [vmem:[%s2907_s9 + $0x18] sm:$0xff] %vm633_vm0, %v1190_v33  ;;  %v1322_v5 = vsel %vm633_vm0, %v1306_v49, 0.0  ;;  %v1185_v40 = vadd.f32 %v1184_v25, %v1040_v41  ;;  %v1309_v27 = vmul.f32 %v1190_v33, %v1190_v33  ;;  %v1274_v17 = vsel %vm633_vm0, %v1190_v33, 0.0 }
 0x19a   : > { %v1843_v62 = vpop.f32.mrf.mxu0  ;;  %v1849_v63 = vpop.f32.mrf.mxu1  ;;  %v1324_v19 = vadd.f32 %v1323_v6, %v1322_v5  ;;  %v1794_v24 = vadd.f32 %v1793_v16, %v1792_v32  ;;  %v1711_v47 = vadd.f32 %v3050_v31, %v3049_v9 }
 0x19b   : > { %v1200_v23 = vadd.f32 %v1843_v62, %v1055_v51  ;;  %v2940_v22 = vadd.f32 %v1849_v63, %v1075_v15  ;;  %1255 = vst.msk [vmem:[%s2907_s9 + $0x10] sm:$0xff] %vm633_vm0, %v1185_v40  ;;  %v1272_v29 = vsel %vm633_vm0, %v1185_v40, 0.0  ;;  %v1308_v14 = vmul.f32 %v1185_v40, %v1185_v40 }
 0x19c   : > { %v1194_v30 = vpop.f32.mrf.mxu0  ;;  %v1214_v42 = vpop.f32.mrf.mxu1  ;;  %v1273_v61 = vadd.f32 %v1272_v29, %v1271_v2  ;;  %v1327_v53 = vsel %vm633_vm0, %v1309_v27, 0.0  ;;  %v1105_v25 = vadd.f32 %v1794_v24, %v1714_v59 }
 0x19d   : > { %1258 = vst.msk [vmem:[%s2907_s9 + $0x28] sm:$0xff] %vm633_vm0, %v1200_v23  ;;  %1262 = vst.msk [vmem:[%s2907_s9 + $0x48] sm:$0xff] %vm633_vm0, %v2940_v22  ;;  %v1325_v46 = vsel %vm633_vm0, %v1308_v14, 0.0  ;;  %v1195_v45 = vadd.f32 %v1194_v30, %v1050_v34  ;;  %v1215_v56 = vadd.f32 %v1214_v42, %v1070_v39  ;;  %v1311_v8 = vmul.f32 %v1200_v23, %v1200_v23 }
 0x19e   : > { %v1846_v35 = vpop.f32.mrf.mxu0  ;;  %v1852_v44 = vpop.f32.mrf.mxu1  ;;  %v1326_v48 = vadd.f32 %v1325_v46, %v1324_v19  ;;  %v1275_v38 = vadd.f32 %v1274_v17, %v1273_v61  ;;  %v1278_v37 = vsel %vm633_vm0, %v1200_v23, 0.0  ;;  %v1315_v27 = vmul.f32 %v2940_v22, %v2940_v22 }
 0x19f   : > { %v1210_v41 = vadd.f32 %v1846_v35, %v1065_v60  ;;  %1257 = vst.msk [vmem:[%s2907_s9 + $0x20] sm:$0xff] %vm633_vm0, %v1195_v45  ;;  %v1276_v28 = vsel %vm633_vm0, %v1195_v45, 0.0  ;;  %v1310_v11 = vmul.f32 %v1195_v45, %v1195_v45  ;;  %1261 = vst.msk [vmem:[%s2907_s9 + $0x40] sm:$0xff] %vm633_vm0, %v1215_v56  ;;  %v1230_v52 = vadd.f32 %v1852_v44, %v1085_v57 }
 0x1a0   : > { %v1204_v4 = vpop.f32.mrf.mxu0  ;;  %v1224_v34 = vpop.f32.mrf.mxu1  ;;  %v1277_v12 = vadd.f32 %v1276_v28, %v1275_v38  ;;  %v1328_v55 = vadd.f32 %v1327_v53, %v1326_v48  ;;  %v1331_v13 = vsel %vm633_vm0, %v1311_v8, 0.0  ;;  %v1314_v5 = vmul.f32 %v1215_v56, %v1215_v56 }
 0x1a1   : > { %1260 = vst.msk [vmem:[%s2907_s9 + $0x38] sm:$0xff] %vm633_vm0, %v1210_v41  ;;  %v1329_v32 = vsel %vm633_vm0, %v1310_v11, 0.0  ;;  %v1205_v51 = vadd.f32 %v1204_v4, %v2923_v21  ;;  %v1225_v33 = vadd.f32 %v1224_v34, %v1080_v7  ;;  %1264 = vst.msk [vmem:[%s2907_s9 + $0x58] sm:$0xff] %vm633_vm0, %v1230_v52  ;;  %v1313_v21 = vmul.f32 %v1210_v41, %v1210_v41 }
 0x1a2   : > { %v1855_v58 = vpop.f32.mrf.mxu1  ;;  %v1330_v3 = vadd.f32 %v1329_v32, %v1328_v55  ;;  %v1279_v49 = vadd.f32 %v1278_v37, %v1277_v12  ;;  %v1282_v15 = vsel %vm633_vm0, %v1210_v41, 0.0  ;;  %v1284_v2 = vsel %vm633_vm0, %v1215_v56, 0.0 }
 0x1a3   : > { %1259 = vst.msk [vmem:[%s2907_s9 + $0x30] sm:$0xff] %vm633_vm0, %v1205_v51  ;;  %v1280_v0 = vsel %vm633_vm0, %v1205_v51, 0.0  ;;  %v1312_v60 = vmul.f32 %v1205_v51, %v1205_v51  ;;  %1263 = vst.msk [vmem:[%s2907_s9 + $0x50] sm:$0xff] %vm633_vm0, %v1225_v33  ;;  %v1240_v7 = vadd.f32 %v1855_v58, %v1095_v18  ;;  %v1100_v57 = vadd.f32 %v1791_v50, %v1711_v47 }
 0x1a4   : > { %v1234_v16 = vpop.f32.mrf.mxu1  ;;  %v1281_v39 = vadd.f32 %v1280_v0, %v1279_v49  ;;  %v1332_v26 = vadd.f32 %v1331_v13, %v1330_v3  ;;  %v1335_v29 = vsel %vm633_vm0, %v1313_v21, 0.0  ;;  %v1286_v30 = vsel %vm633_vm0, %v2940_v22, 0.0 }
 0x1a5   : > { %v1235_v36 = vadd.f32 %v1234_v16, %v1090_v10  ;;  %v1333_v62 = vsel %vm633_vm0, %v1312_v60, 0.0  ;;  %1266 = vst.msk [vmem:[%s2907_s9 + $0x68] sm:$0xff] %vm633_vm0, %v1240_v7  ;;  %v1337_v20 = vsel %vm633_vm0, %v1314_v5, 0.0  ;;  %v1316_v19 = vmul.f32 %v1225_v33, %v1225_v33 }
 0x1a6   : > { %v1858_v43 = vpop.f32.mrf.mxu1  ;;  %v1283_v40 = vadd.f32 %v1282_v15, %v1281_v39  ;;  %v1334_v23 = vadd.f32 %v1333_v62, %v1332_v26  ;;  %v1288_v61 = vsel %vm633_vm0, %v1225_v33, 0.0  ;;  %v1339_v46 = vsel %vm633_vm0, %v1315_v27, 0.0 }
 0x1a7   : > { %v1250_v63 = vadd.f32 %v1858_v43, %v1105_v25  ;;  %1265 = vst.msk [vmem:[%s2907_s9 + $0x60] sm:$0xff] %vm633_vm0, %v1235_v36  ;;  %v1317_v45 = vmul.f32 %v1230_v52, %v1230_v52  ;;  %v1290_v35 = vsel %vm633_vm0, %v1230_v52, 0.0  ;;  %v1341_v22 = vsel %vm633_vm0, %v1316_v19, 0.0 }
 0x1a8   : > { %v1244_v6 = vpop.f32.mrf.mxu1  ;;  %v1285_v14 = vadd.f32 %v1284_v2, %v1283_v40  ;;  %v1336_v42 = vadd.f32 %v1335_v29, %v1334_v23  ;;  %v1318_v48 = vmul.f32 %v1235_v36, %v1235_v36  ;;  %v1292_v41 = vsel %vm633_vm0, %v1235_v36, 0.0 }
 0x1a9   : > { %1268 = vst.msk [vmem:[%s2907_s9 + $0x78] sm:$0xff] %vm633_vm0, %v1250_v63  ;;  %v1245_v1 = vadd.f32 %v1244_v6, %v1100_v57  ;;  %v1343_v53 = vsel %vm633_vm0, %v1317_v45, 0.0  ;;  %v1319_v8 = vmul.f32 %v1240_v7, %v1240_v7  ;;  %v1294_v11 = vsel %vm633_vm0, %v1240_v7, 0.0 }
 0x1aa   : > { %v1287_v54 = vadd.f32 %v1286_v30, %v1285_v14  ;;  %v1338_v17 = vadd.f32 %v1337_v20, %v1336_v42  ;;  %v1345_v34 = vsel %vm633_vm0, %v1318_v48, 0.0  ;;  %v1321_v32 = vmul.f32 %v1250_v63, %v1250_v63 }
 0x1ab   : > { %1267 = vst.msk [vmem:[%s2907_s9 + $0x70] sm:$0xff] %vm633_vm0, %v1245_v1  ;;  %v1320_v12 = vmul.f32 %v1245_v1, %v1245_v1  ;;  %v1296_v10 = vsel %vm633_vm0, %v1245_v1, 0.0  ;;  %v1347_v37 = vsel %vm633_vm0, %v1319_v8, 0.0  ;;  %v1298_v51 = vsel %vm633_vm0, %v1250_v63, 0.0 }
 0x1ac   : > { %v1289_v56 = vadd.f32 %v1288_v61, %v1287_v54  ;;  %v1340_v44 = vadd.f32 %v1339_v46, %v1338_v17  ;;  %v1351_v18 = vsel %vm633_vm0, %v1321_v32, 0.0 }
 0x1ad   : > { %v1349_v49 = vsel %vm633_vm0, %v1320_v12, 0.0 }
 0x1ae   : > { %v1291_v24 = vadd.f32 %v1290_v35, %v1289_v56  ;;  %v1342_v38 = vadd.f32 %v1341_v22, %v1340_v44 }
 0x1b0   : > { %v1293_v28 = vadd.f32 %v1292_v41, %v1291_v24  ;;  %v1344_v4 = vadd.f32 %v1343_v53, %v1342_v38 }
 0x1b2   : > { %v1295_v59 = vadd.f32 %v1294_v11, %v1293_v28  ;;  %v1346_v55 = vadd.f32 %v1345_v34, %v1344_v4 }
 0x1b4   : > { %v1297_v52 = vadd.f32 %v1296_v10, %v1295_v59  ;;  %v1348_v58 = vadd.f32 %v1347_v37, %v1346_v55 }
 0x1b6   : > { %v1299_v3 = vadd.f32 %v1298_v51, %v1297_v52  ;;  %v1350_v33 = vadd.f32 %v1349_v49, %v1348_v58 }
 0x1b8   : > { %v1300_v50 = vrot.slane %v1299_v3, 4  ;;  %v1352_v13 = vadd.f32 %v1351_v18, %v1350_v33 }
 0x1ba   : > { %v1301_v0 = vadd.f32 %v1300_v50, %v1299_v3  ;;  %v1353_v16 = vrot.slane %v1352_v13, 4 }
 0x1bc   : > { %v1302_v25 = vrot.slane %v1301_v0, 2  ;;  %v1354_v21 = vadd.f32 %v1353_v16, %v1352_v13 }
 0x1be   : > { %v1303_v39 = vadd.f32 %v1302_v25, %v1301_v0  ;;  %v1355_v60 = vrot.slane %v1354_v21, 2 }
 0x1c0   : > { %v1304_v26 = vrot.slane %v1303_v39, 1  ;;  %v1356_v9 = vadd.f32 %v1355_v60, %v1354_v21 }
 0x1c2   : > { %v1357_v31 = vrot.slane %v1356_v9, 1  ;;  %v1305_v47 = vadd.f32 %v1304_v26, %v1303_v39 }
 0x1c4   : > { %v1358_v15 = vadd.f32 %v1357_v31, %v1356_v9 }
 0x1c6   : > { %v1360_v7 = vsel %vm1359_vm1, %v1305_v47, %v1358_v15 }
 0x1c7   : > { %1362 = vst.msk [vmem:[%s230_s23] sm:$0x3] %vm1361_vm2, %v1360_v7 }
 0x1c8 PF: > { %s14_s16 = sadd.s32 1, %s2116_s16   ;;  %s3051_s12 = smov %s2108_s14 }
 0x1c9   : > { %p11_p8 = scmp.ge.s32.totalorder %s14_s16, 6   ;;  %s3052_s13 = smov %s2112_s15 }
 0x1ca   : > { %s3053_s14 = smov %s3056_s17  ;;  %s3054_s15 = smov %s3060_s18 }
 0x1cb   :  { %13 = sbr.rel (!%p11_p8) target bundleno = 3 (0x3), region = 72 }

</bundles_post_ra>
